<compile_context>
chip_gen: v7x
topology: tpu7x:2x2x1
jax: 0.10.0
libtpu: 0.0.40
codegen_flags: <defaults>
</compile_context>

<pallas_src>
import math
import jax
import jax.numpy as jnp
from jax.experimental import pallas as pl
from jax.experimental.pallas import tpu as pltpu

# ---------------- small synthetic configuration ----------------
BATCH = 8
BODY_LEN = 3
N_ENT = 128                 # n_ent_vocab
N_REL = 6                   # n_rel_vocab (even)
NUM_POS_REL = N_REL // 2
TRG_VOCAB = N_REL + 1       # fwd rels, inverse rels, identity ("stay", last real col)
V_PAD = 128                 # vocab padded to a full lane tile; real cols 0..TRG_VOCAB-1
D_MODEL = 128
SRC_LEN = 2                 # query = (head, relation)
THR = 1e-20                 # the registered 'thr' buffer
NEG_INF = -1e30             # bias for padded vocab columns -> softmax prob exactly 0


# ---------------- fused Pallas kernel: greedy decode + forwardAllNLP ----------
# Per step l (fully unrolled, BODY_LEN steps):
#   att_l  = softmax(trg_word_prj(decoder(emb[tok_l], enc)))   (decoder = one
#            cross-attn layer, no self-attn -> positions independent, so the
#            fused chain equals the reference's 3 separate decode calls)
#   tok_{l+1} = argmax(att_l)                                  (emitted)
#   mem    = sum_r (mem @ adj_block_r) * att_l[:, r] + mem * att_l[:, last]
# Final: mem / max(thr, sum(mem)) is the memories tensor (NLL/ranking in JAX).
def fused_kernel(enc_ref, wkv_ref, qp_ref, wop_ref, bp_ref, rhs_ref, mem0_ref,
                 tok_ref, mem_out_ref):
    # enc_ref : (SRC_LEN*B, D)      bf16 encoder output (rows blocked by B)
    # wkv_ref : (D, 2D)             bf16 [wk | wv]
    # qp_ref  : (V_PAD, D + V_PAD)  bf16 [trg_emb @ wq_scaled | trg_emb @ wp_pad]
    # wop_ref : (D, V_PAD)          bf16 wo @ wp_pad
    # bp_ref  : (1, V_PAD)          f32  0 on real cols, NEG_INF on pad cols
    # rhs_ref : (E, 2P*E)           bf16 stacked adjacency [adj_r ... adj_r^T ...]
    # mem0_ref: (B, E)              f32  one-hot of query heads
    # tok_ref : (BODY_LEN, B, 1)    int32 greedy tokens (gen_seq[:, 1:])
    # mem_out : (B, E)              f32  normalized memories

    # Hoisted K/V projection: one bf16 MXU push, constant across every step.
    kv = jnp.dot(enc_ref[...], wkv_ref[...],
                 preferred_element_type=jnp.float32)           # (S*B, 2D) f32

    col = jax.lax.broadcasted_iota(jnp.int32, (BATCH, V_PAD), 1)
    bp = bp_ref[...]                                           # (1, V_PAD) f32
    tok = jnp.zeros((BATCH, 1), jnp.int32)                     # init_seq (token 0)
    mem = mem0_ref[...]                                        # (B, E) f32 KG state

    for step in range(BODY_LEN):                               # fused greedy + KG loop
        # ---- decode step ----
        onehot = (col == tok).astype(jnp.bfloat16)             # (B, V_PAD), exact 0/1
        qe = jnp.dot(onehot, qp_ref[...],
                     preferred_element_type=jnp.float32)       # (B, D+V_PAD)
        q = qe[:, :D_MODEL]                                    # scaled query
        embp = qe[:, D_MODEL:]                                 # emb @ wp (residual term)

        # 2-way cross-attention over the SRC_LEN encoder positions (VPU/XLU)
        ss = []
        for si in range(SRC_LEN):
            k_si = kv[si * BATCH:(si + 1) * BATCH, :D_MODEL]
            ss.append(jnp.sum(q * k_si, axis=-1, keepdims=True))   # (B, 1)
        m = ss[0]
        for s_ in ss[1:]:
            m = jnp.maximum(m, s_)
        es = [jnp.exp(s_ - m) for s_ in ss]
        den = es[0]
        for e_ in es[1:]:
            den = den + e_
        inv = 1.0 / den
        v0 = kv[0:BATCH, D_MODEL:]
        ctx = (es[0] * inv) * v0
        for si in range(1, SRC_LEN):
            v_si = kv[si * BATCH:(si + 1) * BATCH, D_MODEL:]
            ctx = ctx + (es[si] * inv) * v_si                  # (B, D) f32

        # logits = (ctx@wo + emb) @ wp + bp, with wo@wp and emb@wp pre-fused
        logits = jnp.dot(ctx.astype(jnp.bfloat16), wop_ref[...],
                         preferred_element_type=jnp.float32) + embp + bp

        # greedy next token straight from logits (argmax is softmax-invariant;
        # pad cols carry NEG_INF so they can never win) -> shortest serial chain
        lmax = jnp.max(logits, axis=-1, keepdims=True)
        cand = jnp.where(logits >= lmax, col, V_PAD)
        tok = jnp.min(cand, axis=-1, keepdims=True)            # (B, 1) first-max index
        tok_ref[step] = tok

        # exact softmax only for the attention that feeds the KG / loss
        el = jnp.exp(logits - lmax)
        att_s = el / jnp.sum(el, axis=-1, keepdims=True)       # pad cols exactly 0

        # ---- KG propagation with this step's attention ----
        # one wide bf16 MXU push against the stacked adjacency; f32 accumulation
        big = jnp.dot(mem.astype(jnp.bfloat16), rhs_ref[...],
                      preferred_element_type=jnp.float32)      # (B, 2P*E)
        added = mem * att_s[:, TRG_VOCAB - 1:TRG_VOCAB]        # identity ("stay") term
        for r in range(2 * NUM_POS_REL):                       # 128-aligned lane slices
            added = added + big[:, r * N_ENT:(r + 1) * N_ENT] * att_s[:, r:r + 1]
        mem = added                                            # stays f32

    denom = jnp.maximum(THR, jnp.sum(mem, axis=1, keepdims=True))
    mem_out_ref[...] = mem / denom


def fused_forward(enc_flat, rhs, mem0, params):
    # TODO(synk): for realistic N_ENT (>~1k on v7x 64MiB VMEM) tile the stacked
    # adjacency over 128-aligned column blocks (parallel leading grid axis for
    # the second v7x TensorCore) instead of one whole-tensor block.
    SB, D = enc_flat.shape
    B, E = mem0.shape
    KW = rhs.shape[1]
    return pl.pallas_call(
        fused_kernel,
        out_shape=(jax.ShapeDtypeStruct((BODY_LEN, B, 1), jnp.int32),
                   jax.ShapeDtypeStruct((B, E), jnp.float32)),
        grid=(1,),
        in_specs=[
            pl.BlockSpec((SB, D), lambda i: (0, 0)),
            pl.BlockSpec((D, 2 * D), lambda i: (0, 0)),
            pl.BlockSpec((V_PAD, D + V_PAD), lambda i: (0, 0)),
            pl.BlockSpec((D, V_PAD), lambda i: (0, 0)),
            pl.BlockSpec((1, V_PAD), lambda i: (0, 0)),
            pl.BlockSpec((E, KW), lambda i: (0, 0)),
            pl.BlockSpec((B, E), lambda i: (0, 0)),
        ],
        out_specs=(pl.BlockSpec((BODY_LEN, B, 1), lambda i: (0, 0, 0)),
                   pl.BlockSpec((B, E), lambda i: (0, 0))),
        compiler_params=pltpu.CompilerParams(dimension_semantics=("arbitrary",)),
    )(enc_flat, params["wkv_bf"], params["qp_bf"], params["wop_bf"],
      params["bp_pad"], rhs, mem0)


# ---------------- deterministic synthetic model -----------------
def init_params(key):
    ks = jax.random.split(key, 9)
    s = 1.0 / math.sqrt(D_MODEL)
    trg_emb = jax.random.normal(ks[2], (TRG_VOCAB, D_MODEL), jnp.float32) * s
    wp = jax.random.normal(ks[8], (D_MODEL, TRG_VOCAB), jnp.float32) * s
    wq = jax.random.normal(ks[4], (D_MODEL, D_MODEL), jnp.float32) * s
    wk = jax.random.normal(ks[5], (D_MODEL, D_MODEL), jnp.float32) * s
    wv = jax.random.normal(ks[6], (D_MODEL, D_MODEL), jnp.float32) * s
    wo = jax.random.normal(ks[7], (D_MODEL, D_MODEL), jnp.float32) * s

    trg_emb_pad = jnp.zeros((V_PAD, D_MODEL), jnp.float32).at[:TRG_VOCAB].set(trg_emb)
    wp_pad = jnp.zeros((D_MODEL, V_PAD), jnp.float32).at[:, :TRG_VOCAB].set(wp)
    bp_pad = jnp.full((1, V_PAD), NEG_INF, jnp.float32).at[:, :TRG_VOCAB].set(0.0)

    # fused decode tables (1/sqrt(D) attention scale folded into the q branch)
    wq_scaled = wq * (1.0 / math.sqrt(D_MODEL))
    qp = jnp.concatenate([trg_emb_pad @ wq_scaled, trg_emb_pad @ wp_pad], axis=1)
    wop = wo @ wp_pad
    wkv = jnp.concatenate([wk, wv], axis=1)

    return dict(
        ent_emb=jax.random.normal(ks[0], (N_ENT, D_MODEL), jnp.float32) * s,
        rel_emb=jax.random.normal(ks[1], (N_REL, D_MODEL), jnp.float32) * s,
        w_enc=jax.random.normal(ks[3], (D_MODEL, D_MODEL), jnp.float32) * s,
        qp_bf=qp.astype(jnp.bfloat16),
        wop_bf=wop.astype(jnp.bfloat16),
        wkv_bf=wkv.astype(jnp.bfloat16),
        bp_pad=bp_pad,
    )


def encoder(query, params):
    # glue: embedding lookup + linear ("model.encoder")
    head_e = params["ent_emb"][query[:, 0]]          # (B, D)
    rel_e = params["rel_emb"][query[:, 1]]           # (B, D)
    src = jnp.stack([head_e, rel_e], axis=1)         # (B, 2, D)
    return jnp.tanh(src @ params["w_enc"])           # (B, 2, D)


def build_stacked_rhs(adj_database):
    # (P, E, E) 0/1 adjacency -> (E, 2*P*E) bf16 column blocks
    # [adj_0, ..., adj_{P-1}, adj_0^T, ..., adj_{P-1}^T]; 0/1 is exact in bf16.
    adjt = jnp.transpose(adj_database, (0, 2, 1))
    stacked = jnp.concatenate([adj_database, adjt], axis=0)          # (2P, E, E)
    rhs = jnp.transpose(stacked, (1, 0, 2)).reshape(
        N_ENT, 2 * NUM_POS_REL * N_ENT)
    return rhs.astype(jnp.bfloat16)


# ---------------- Translator.forward --------------------------
def translator_forward(query, t, s, rhs_stacked, params, mode="train"):
    B = query.shape[0]
    enc_out = encoder(query, params)                                  # (B, 2, D) glue
    # single activation input to the fused kernel, laid out (SRC_LEN*B, D)
    enc_flat = jnp.transpose(enc_out, (1, 0, 2)).reshape(
        SRC_LEN * B, D_MODEL).astype(jnp.bfloat16)

    # ---- edge removal (shared database across the batch, as in the reference) ----
    # TODO(synk): at realistic E, pass (h, r, t) via scalar prefetch and correct the
    # matmul inside the kernel instead of scatter-copying the full adjacency per call.
    hh, rr, tt = query[:, 0], query[:, 1], t
    mask = rr < NUM_POS_REL
    rr_c = jnp.where(mask, rr, 0)
    w = jnp.where(mask, 0.0, 1.0).astype(rhs_stacked.dtype)
    rhs = rhs_stacked.at[hh, rr_c * N_ENT + tt].multiply(w)
    rhs = rhs.at[tt, (NUM_POS_REL + rr_c) * N_ENT + hh].multiply(w)

    mem0 = jax.nn.one_hot(query[:, 0], N_ENT, dtype=jnp.float32)

    # ONE fused launch: greedy decode chain + forwardAllNLP propagation
    tokens, memories = fused_forward(enc_flat, rhs, mem0, params)
    # tokens: (BODY_LEN, B, 1) int32, memories: (B, E) f32

    gen_seq = jnp.zeros((B, BODY_LEN + 1), jnp.int32)
    gen_seq = gen_seq.at[:, 1:].set(tokens[..., 0].T)
    gen_seq = gen_seq.at[:, 0].set(query[:, 1])

    # NLL loss in JAX (f32)
    targets = jax.nn.one_hot(t, N_ENT, dtype=jnp.float32)
    loss_vec = -jnp.sum(targets * jnp.log(jnp.maximum(THR, memories)), axis=1)
    batch_loss = jnp.mean(loss_vec)

    # TODO(synk): mode != 'train' filtering needs kg.filtered_dict (external data);
    # only the 'train' ranking path is modeled.
    # ranking = rank of t under a stable descending sort, via compare+count
    # (one VPU pass, no O(E log E) sort)
    m_t = jnp.take_along_axis(memories, t[:, None], axis=1)          # (B, 1)
    ent_idx = jnp.arange(N_ENT, dtype=jnp.int32)[None, :]
    index = jnp.sum((memories > m_t) |
                    ((memories == m_t) & (ent_idx < t[:, None])), axis=1).astype(jnp.int32)

    # TODO(synk): decode_rule() DFS + rule-file writing is host-side I/O; not modeled.
    return gen_seq, batch_loss, index


# ---------------- demo ----------------------------------------
if __name__ == "__main__":
    key = jax.random.PRNGKey(0)
    k_param, k_adj, k_q1, k_q2, k_t, k_s = jax.random.split(key, 6)

    params = init_params(k_param)
    # kg.relations: one (N_ENT, N_ENT) 0/1 adjacency per positive relation (dense here)
    adj_database = (jax.random.uniform(k_adj, (NUM_POS_REL, N_ENT, N_ENT))
                    < 0.05).astype(jnp.float32)
    rhs_stacked = build_stacked_rhs(adj_database)     # built once: the KG is static

    query = jnp.stack(
        [jax.random.randint(k_q1, (BATCH,), 0, N_ENT),
         jax.random.randint(k_q2, (BATCH,), 0, N_REL)], axis=1).astype(jnp.int32)
    t = jax.random.randint(k_t, (BATCH,), 0, N_ENT).astype(jnp.int32)
    s = jax.random.uniform(k_s, (BATCH,), jnp.float32)  # confidences (unused in train)

    fwd = jax.jit(translator_forward, static_argnames=("mode",))
    gen_seq, loss, index = fwd(query, t, s, rhs_stacked, params, mode="train")
    jax.block_until_ready((gen_seq, loss, index))
    assert gen_seq.shape == (BATCH, BODY_LEN + 1)
    assert index.shape == (BATCH,)
    assert bool(jnp.isfinite(loss))
    print("KERNEL_OK")
</pallas_src>

<mosaic_0001>
module attributes {stable_mosaic.version = 11 : i64} {
  func.func @fused_kernel(%arg0: i32, %arg1: memref<16x128xbf16, #tpu.memory_space<vmem>>, %arg2: memref<128x256xbf16, #tpu.memory_space<vmem>>, %arg3: memref<128x256xbf16, #tpu.memory_space<vmem>>, %arg4: memref<128x128xbf16, #tpu.memory_space<vmem>>, %arg5: memref<1x128xf32, #tpu.memory_space<vmem>>, %arg6: memref<128x768xbf16, #tpu.memory_space<vmem>>, %arg7: memref<8x128xf32, #tpu.memory_space<vmem>>, %arg8: memref<3x8x1xi32, #tpu.memory_space<vmem>>, %arg9: memref<8x128xf32, #tpu.memory_space<vmem>>) attributes {dimension_semantics = [#tpu.dimension_semantics<arbitrary>], iteration_bounds = array<i64: 1>, scalar_prefetch = 0 : i64, scratch_operands = 0 : i64, tpu.core_type = #tpu.core_type<tc>, window_params = [{pipeline_mode = #tpu.pipeline_mode<synchronous>, transform_indices = @transform_0, window_bounds = array<i64: 16, 128>}, {pipeline_mode = #tpu.pipeline_mode<synchronous>, transform_indices = @transform_1, window_bounds = array<i64: 128, 256>}, {pipeline_mode = #tpu.pipeline_mode<synchronous>, transform_indices = @transform_2, window_bounds = array<i64: 128, 256>}, {pipeline_mode = #tpu.pipeline_mode<synchronous>, transform_indices = @transform_3, window_bounds = array<i64: 128, 128>}, {pipeline_mode = #tpu.pipeline_mode<synchronous>, transform_indices = @transform_4, window_bounds = array<i64: 1, 128>}, {pipeline_mode = #tpu.pipeline_mode<synchronous>, transform_indices = @transform_5, window_bounds = array<i64: 128, 768>}, {pipeline_mode = #tpu.pipeline_mode<synchronous>, transform_indices = @transform_6, window_bounds = array<i64: 8, 128>}, {pipeline_mode = #tpu.pipeline_mode<synchronous>, transform_indices = @transform_7, window_bounds = array<i64: 3, 8, 1>}, {pipeline_mode = #tpu.pipeline_mode<synchronous>, transform_indices = @transform_8, window_bounds = array<i64: 8, 128>}]} {
    %c0 = arith.constant 0 : index
    %c0_0 = arith.constant 0 : index
    %0 = vector.load %arg1[%c0, %c0_0] : memref<16x128xbf16, #tpu.memory_space<vmem>>, vector<16x128xbf16>
    %c0_1 = arith.constant 0 : index
    %c0_2 = arith.constant 0 : index
    %1 = vector.load %arg2[%c0_1, %c0_2] : memref<128x256xbf16, #tpu.memory_space<vmem>>, vector<128x256xbf16>
    %cst = arith.constant dense<0.000000e+00> : vector<16x256xf32>
    %2 = tpu.matmul %0, %1, %cst {dimension_numbers = #tpu.dot_dimension_numbers<[1], [0], [0], [1], [0, 0, 1, 1], [], []>} : vector<16x128xbf16>, vector<128x256xbf16>, vector<16x256xf32> -> vector<16x256xf32>
    %3 = tpu.iota {dimensions = array<i32: 1>} : vector<8x128xi32>
    %c0_3 = arith.constant 0 : index
    %c0_4 = arith.constant 0 : index
    %4 = vector.load %arg5[%c0_3, %c0_4] : memref<1x128xf32, #tpu.memory_space<vmem>>, vector<1x128xf32>
    %c0_i32 = arith.constant 0 : i32
    %5 = vector.broadcast %c0_i32 : i32 to vector<8x1xi32>
    %c0_5 = arith.constant 0 : index
    %c0_6 = arith.constant 0 : index
    %6 = vector.load %arg7[%c0_5, %c0_6] : memref<8x128xf32, #tpu.memory_space<vmem>>, vector<8x128xf32>
    %7 = vector.broadcast %5 : vector<8x1xi32> to vector<8x128xi32>
    %8 = arith.cmpi eq, %3, %7 : vector<8x128xi32>
    %9 = arith.extui %8 : vector<8x128xi1> to vector<8x128xi32>
    %10 = arith.sitofp %9 : vector<8x128xi32> to vector<8x128xf32>
    %11 = arith.truncf %10 : vector<8x128xf32> to vector<8x128xbf16>
    %c0_7 = arith.constant 0 : index
    %c0_8 = arith.constant 0 : index
    %12 = vector.load %arg3[%c0_7, %c0_8] : memref<128x256xbf16, #tpu.memory_space<vmem>>, vector<128x256xbf16>
    %cst_9 = arith.constant dense<0.000000e+00> : vector<8x256xf32>
    %13 = tpu.matmul %11, %12, %cst_9 {dimension_numbers = #tpu.dot_dimension_numbers<[1], [0], [0], [1], [0, 0, 1, 1], [], []>} : vector<8x128xbf16>, vector<128x256xbf16>, vector<8x256xf32> -> vector<8x256xf32>
    %14 = vector.extract_strided_slice %13 {offsets = [0, 0], sizes = [8, 128], strides = [1, 1]} : vector<8x256xf32> to vector<8x128xf32>
    %15 = vector.extract_strided_slice %13 {offsets = [0, 128], sizes = [8, 128], strides = [1, 1]} : vector<8x256xf32> to vector<8x128xf32>
    %16 = vector.extract_strided_slice %2 {offsets = [0, 0], sizes = [8, 128], strides = [1, 1]} : vector<16x256xf32> to vector<8x128xf32>
    %17 = arith.mulf %14, %16 : vector<8x128xf32>
    %cst_10 = arith.constant dense<0.000000e+00> : vector<8xf32>
    %18 = vector.multi_reduction <add>, %17, %cst_10 [1] : vector<8x128xf32> to vector<8xf32>
    %19 = vector.shape_cast %18 : vector<8xf32> to vector<8x1xf32>
    %20 = vector.extract_strided_slice %2 {offsets = [8, 0], sizes = [8, 128], strides = [1, 1]} : vector<16x256xf32> to vector<8x128xf32>
    %21 = arith.mulf %14, %20 : vector<8x128xf32>
    %cst_11 = arith.constant dense<0.000000e+00> : vector<8xf32>
    %22 = vector.multi_reduction <add>, %21, %cst_11 [1] : vector<8x128xf32> to vector<8xf32>
    %23 = vector.shape_cast %22 : vector<8xf32> to vector<8x1xf32>
    %24 = arith.maximumf %19, %23 : vector<8x1xf32>
    %25 = arith.subf %19, %24 : vector<8x1xf32>
    %26 = math.exp %25 : vector<8x1xf32>
    %27 = arith.subf %23, %24 : vector<8x1xf32>
    %28 = math.exp %27 : vector<8x1xf32>
    %29 = arith.addf %26, %28 : vector<8x1xf32>
    %cst_12 = arith.constant 1.000000e+00 : f32
    %30 = vector.broadcast %cst_12 : f32 to vector<8x1xf32>
    %31 = arith.divf %30, %29 : vector<8x1xf32>
    %32 = vector.extract_strided_slice %2 {offsets = [0, 128], sizes = [8, 128], strides = [1, 1]} : vector<16x256xf32> to vector<8x128xf32>
    %33 = arith.mulf %26, %31 : vector<8x1xf32>
    %34 = vector.broadcast %33 : vector<8x1xf32> to vector<8x128xf32>
    %35 = arith.mulf %34, %32 : vector<8x128xf32>
    %36 = vector.extract_strided_slice %2 {offsets = [8, 128], sizes = [8, 128], strides = [1, 1]} : vector<16x256xf32> to vector<8x128xf32>
    %37 = arith.mulf %28, %31 : vector<8x1xf32>
    %38 = vector.broadcast %37 : vector<8x1xf32> to vector<8x128xf32>
    %39 = arith.mulf %38, %36 : vector<8x128xf32>
    %40 = arith.addf %35, %39 : vector<8x128xf32>
    %41 = arith.truncf %40 : vector<8x128xf32> to vector<8x128xbf16>
    %c0_13 = arith.constant 0 : index
    %c0_14 = arith.constant 0 : index
    %42 = vector.load %arg4[%c0_13, %c0_14] : memref<128x128xbf16, #tpu.memory_space<vmem>>, vector<128x128xbf16>
    %cst_15 = arith.constant dense<0.000000e+00> : vector<8x128xf32>
    %43 = tpu.matmul %41, %42, %cst_15 {dimension_numbers = #tpu.dot_dimension_numbers<[1], [0], [0], [1], [0, 0, 1, 1], [], []>} : vector<8x128xbf16>, vector<128x128xbf16>, vector<8x128xf32> -> vector<8x128xf32>
    %44 = arith.addf %43, %15 : vector<8x128xf32>
    %45 = vector.broadcast %4 : vector<1x128xf32> to vector<8x128xf32>
    %46 = arith.addf %44, %45 : vector<8x128xf32>
    %cst_16 = arith.constant dense<0xFF800000> : vector<8xf32>
    %47 = vector.multi_reduction <maximumf>, %46, %cst_16 [1] : vector<8x128xf32> to vector<8xf32>
    %48 = vector.shape_cast %47 : vector<8xf32> to vector<8x1xf32>
    %49 = vector.broadcast %48 : vector<8x1xf32> to vector<8x128xf32>
    %50 = arith.cmpf oge, %46, %49 : vector<8x128xf32>
    %c128_i32 = arith.constant 128 : i32
    %51 = vector.broadcast %c128_i32 : i32 to vector<8x128xi32>
    %52 = arith.select %50, %3, %51 : vector<8x128xi1>, vector<8x128xi32>
    %cst_17 = arith.constant dense<2147483647> : vector<8xi32>
    %53 = vector.multi_reduction <minsi>, %52, %cst_17 [1] : vector<8x128xi32> to vector<8xi32>
    %54 = vector.shape_cast %53 : vector<8xi32> to vector<8x1xi32>
    %c0_18 = arith.constant 0 : index
    %c0_19 = arith.constant 0 : index
    %c0_20 = arith.constant 0 : index
    %55 = vector.load %arg8[%c0_18, %c0_19, %c0_20] : memref<3x8x1xi32, #tpu.memory_space<vmem>>, vector<1x8x1xi32>
    %56 = vector.shape_cast %55 : vector<1x8x1xi32> to vector<8x1xi32>
    %57 = vector.shape_cast %54 : vector<8x1xi32> to vector<1x8x1xi32>
    tpu.vector_store %arg8[%c0_18, %c0_19, %c0_20], %57 {strides = array<i32>} : memref<3x8x1xi32, #tpu.memory_space<vmem>>, vector<1x8x1xi32>,
    %58 = vector.broadcast %48 : vector<8x1xf32> to vector<8x128xf32>
    %59 = arith.subf %46, %58 : vector<8x128xf32>
    %60 = math.exp %59 : vector<8x128xf32>
    %cst_21 = arith.constant dense<0.000000e+00> : vector<8xf32>
    %61 = vector.multi_reduction <add>, %60, %cst_21 [1] : vector<8x128xf32> to vector<8xf32>
    %62 = vector.shape_cast %61 : vector<8xf32> to vector<8x1xf32>
    %63 = vector.broadcast %62 : vector<8x1xf32> to vector<8x128xf32>
    %64 = arith.divf %60, %63 : vector<8x128xf32>
    %65 = arith.truncf %6 : vector<8x128xf32> to vector<8x128xbf16>
    %c0_22 = arith.constant 0 : index
    %c0_23 = arith.constant 0 : index
    %66 = vector.load %arg6[%c0_22, %c0_23] : memref<128x768xbf16, #tpu.memory_space<vmem>>, vector<128x768xbf16>
    %cst_24 = arith.constant dense<0.000000e+00> : vector<8x768xf32>
    %67 = tpu.matmul %65, %66, %cst_24 {dimension_numbers = #tpu.dot_dimension_numbers<[1], [0], [0], [1], [0, 0, 1, 1], [], []>} : vector<8x128xbf16>, vector<128x768xbf16>, vector<8x768xf32> -> vector<8x768xf32>
    %68 = vector.extract_strided_slice %64 {offsets = [0, 6], sizes = [8, 1], strides = [1, 1]} : vector<8x128xf32> to vector<8x1xf32>
    %69 = vector.broadcast %68 : vector<8x1xf32> to vector<8x128xf32>
    %70 = arith.mulf %6, %69 : vector<8x128xf32>
    %71 = vector.extract_strided_slice %67 {offsets = [0, 0], sizes = [8, 128], strides = [1, 1]} : vector<8x768xf32> to vector<8x128xf32>
    %72 = vector.extract_strided_slice %64 {offsets = [0, 0], sizes = [8, 1], strides = [1, 1]} : vector<8x128xf32> to vector<8x1xf32>
    %73 = vector.broadcast %72 : vector<8x1xf32> to vector<8x128xf32>
    %74 = arith.mulf %71, %73 : vector<8x128xf32>
    %75 = arith.addf %70, %74 : vector<8x128xf32>
    %76 = vector.extract_strided_slice %67 {offsets = [0, 128], sizes = [8, 128], strides = [1, 1]} : vector<8x768xf32> to vector<8x128xf32>
    %77 = vector.extract_strided_slice %64 {offsets = [0, 1], sizes = [8, 1], strides = [1, 1]} : vector<8x128xf32> to vector<8x1xf32>
    %78 = vector.broadcast %77 : vector<8x1xf32> to vector<8x128xf32>
    %79 = arith.mulf %76, %78 : vector<8x128xf32>
    %80 = arith.addf %75, %79 : vector<8x128xf32>
    %81 = vector.extract_strided_slice %67 {offsets = [0, 256], sizes = [8, 128], strides = [1, 1]} : vector<8x768xf32> to vector<8x128xf32>
    %82 = vector.extract_strided_slice %64 {offsets = [0, 2], sizes = [8, 1], strides = [1, 1]} : vector<8x128xf32> to vector<8x1xf32>
    %83 = vector.broadcast %82 : vector<8x1xf32> to vector<8x128xf32>
    %84 = arith.mulf %81, %83 : vector<8x128xf32>
    %85 = arith.addf %80, %84 : vector<8x128xf32>
    %86 = vector.extract_strided_slice %67 {offsets = [0, 384], sizes = [8, 128], strides = [1, 1]} : vector<8x768xf32> to vector<8x128xf32>
    %87 = vector.extract_strided_slice %64 {offsets = [0, 3], sizes = [8, 1], strides = [1, 1]} : vector<8x128xf32> to vector<8x1xf32>
    %88 = vector.broadcast %87 : vector<8x1xf32> to vector<8x128xf32>
    %89 = arith.mulf %86, %88 : vector<8x128xf32>
    %90 = arith.addf %85, %89 : vector<8x128xf32>
    %91 = vector.extract_strided_slice %67 {offsets = [0, 512], sizes = [8, 128], strides = [1, 1]} : vector<8x768xf32> to vector<8x128xf32>
    %92 = vector.extract_strided_slice %64 {offsets = [0, 4], sizes = [8, 1], strides = [1, 1]} : vector<8x128xf32> to vector<8x1xf32>
    %93 = vector.broadcast %92 : vector<8x1xf32> to vector<8x128xf32>
    %94 = arith.mulf %91, %93 : vector<8x128xf32>
    %95 = arith.addf %90, %94 : vector<8x128xf32>
    %96 = vector.extract_strided_slice %67 {offsets = [0, 640], sizes = [8, 128], strides = [1, 1]} : vector<8x768xf32> to vector<8x128xf32>
    %97 = vector.extract_strided_slice %64 {offsets = [0, 5], sizes = [8, 1], strides = [1, 1]} : vector<8x128xf32> to vector<8x1xf32>
    %98 = vector.broadcast %97 : vector<8x1xf32> to vector<8x128xf32>
    %99 = arith.mulf %96, %98 : vector<8x128xf32>
    %100 = arith.addf %95, %99 : vector<8x128xf32>
    %101 = vector.broadcast %54 : vector<8x1xi32> to vector<8x128xi32>
    %102 = arith.cmpi eq, %3, %101 : vector<8x128xi32>
    %103 = arith.extui %102 : vector<8x128xi1> to vector<8x128xi32>
    %104 = arith.sitofp %103 : vector<8x128xi32> to vector<8x128xf32>
    %105 = arith.truncf %104 : vector<8x128xf32> to vector<8x128xbf16>
    %c0_25 = arith.constant 0 : index
    %c0_26 = arith.constant 0 : index
    %106 = vector.load %arg3[%c0_25, %c0_26] : memref<128x256xbf16, #tpu.memory_space<vmem>>, vector<128x256xbf16>
    %cst_27 = arith.constant dense<0.000000e+00> : vector<8x256xf32>
    %107 = tpu.matmul %105, %106, %cst_27 {dimension_numbers = #tpu.dot_dimension_numbers<[1], [0], [0], [1], [0, 0, 1, 1], [], []>} : vector<8x128xbf16>, vector<128x256xbf16>, vector<8x256xf32> -> vector<8x256xf32>
    %108 = vector.extract_strided_slice %107 {offsets = [0, 0], sizes = [8, 128], strides = [1, 1]} : vector<8x256xf32> to vector<8x128xf32>
    %109 = vector.extract_strided_slice %107 {offsets = [0, 128], sizes = [8, 128], strides = [1, 1]} : vector<8x256xf32> to vector<8x128xf32>
    %110 = vector.extract_strided_slice %2 {offsets = [0, 0], sizes = [8, 128], strides = [1, 1]} : vector<16x256xf32> to vector<8x128xf32>
    %111 = arith.mulf %108, %110 : vector<8x128xf32>
    %cst_28 = arith.constant dense<0.000000e+00> : vector<8xf32>
    %112 = vector.multi_reduction <add>, %111, %cst_28 [1] : vector<8x128xf32> to vector<8xf32>
    %113 = vector.shape_cast %112 : vector<8xf32> to vector<8x1xf32>
    %114 = vector.extract_strided_slice %2 {offsets = [8, 0], sizes = [8, 128], strides = [1, 1]} : vector<16x256xf32> to vector<8x128xf32>
    %115 = arith.mulf %108, %114 : vector<8x128xf32>
    %cst_29 = arith.constant dense<0.000000e+00> : vector<8xf32>
    %116 = vector.multi_reduction <add>, %115, %cst_29 [1] : vector<8x128xf32> to vector<8xf32>
    %117 = vector.shape_cast %116 : vector<8xf32> to vector<8x1xf32>
    %118 = arith.maximumf %113, %117 : vector<8x1xf32>
    %119 = arith.subf %113, %118 : vector<8x1xf32>
    %120 = math.exp %119 : vector<8x1xf32>
    %121 = arith.subf %117, %118 : vector<8x1xf32>
    %122 = math.exp %121 : vector<8x1xf32>
    %123 = arith.addf %120, %122 : vector<8x1xf32>
    %cst_30 = arith.constant 1.000000e+00 : f32
    %124 = vector.broadcast %cst_30 : f32 to vector<8x1xf32>
    %125 = arith.divf %124, %123 : vector<8x1xf32>
    %126 = vector.extract_strided_slice %2 {offsets = [0, 128], sizes = [8, 128], strides = [1, 1]} : vector<16x256xf32> to vector<8x128xf32>
    %127 = arith.mulf %120, %125 : vector<8x1xf32>
    %128 = vector.broadcast %127 : vector<8x1xf32> to vector<8x128xf32>
    %129 = arith.mulf %128, %126 : vector<8x128xf32>
    %130 = vector.extract_strided_slice %2 {offsets = [8, 128], sizes = [8, 128], strides = [1, 1]} : vector<16x256xf32> to vector<8x128xf32>
    %131 = arith.mulf %122, %125 : vector<8x1xf32>
    %132 = vector.broadcast %131 : vector<8x1xf32> to vector<8x128xf32>
    %133 = arith.mulf %132, %130 : vector<8x128xf32>
    %134 = arith.addf %129, %133 : vector<8x128xf32>
    %135 = arith.truncf %134 : vector<8x128xf32> to vector<8x128xbf16>
    %c0_31 = arith.constant 0 : index
    %c0_32 = arith.constant 0 : index
    %136 = vector.load %arg4[%c0_31, %c0_32] : memref<128x128xbf16, #tpu.memory_space<vmem>>, vector<128x128xbf16>
    %cst_33 = arith.constant dense<0.000000e+00> : vector<8x128xf32>
    %137 = tpu.matmul %135, %136, %cst_33 {dimension_numbers = #tpu.dot_dimension_numbers<[1], [0], [0], [1], [0, 0, 1, 1], [], []>} : vector<8x128xbf16>, vector<128x128xbf16>, vector<8x128xf32> -> vector<8x128xf32>
    %138 = arith.addf %137, %109 : vector<8x128xf32>
    %139 = vector.broadcast %4 : vector<1x128xf32> to vector<8x128xf32>
    %140 = arith.addf %138, %139 : vector<8x128xf32>
    %cst_34 = arith.constant dense<0xFF800000> : vector<8xf32>
    %141 = vector.multi_reduction <maximumf>, %140, %cst_34 [1] : vector<8x128xf32> to vector<8xf32>
    %142 = vector.shape_cast %141 : vector<8xf32> to vector<8x1xf32>
    %143 = vector.broadcast %142 : vector<8x1xf32> to vector<8x128xf32>
    %144 = arith.cmpf oge, %140, %143 : vector<8x128xf32>
    %c128_i32_35 = arith.constant 128 : i32
    %145 = vector.broadcast %c128_i32_35 : i32 to vector<8x128xi32>
    %146 = arith.select %144, %3, %145 : vector<8x128xi1>, vector<8x128xi32>
    %cst_36 = arith.constant dense<2147483647> : vector<8xi32>
    %147 = vector.multi_reduction <minsi>, %146, %cst_36 [1] : vector<8x128xi32> to vector<8xi32>
    %148 = vector.shape_cast %147 : vector<8xi32> to vector<8x1xi32>
    %c1 = arith.constant 1 : index
    %c0_37 = arith.constant 0 : index
    %c0_38 = arith.constant 0 : index
    %149 = vector.load %arg8[%c1, %c0_37, %c0_38] : memref<3x8x1xi32, #tpu.memory_space<vmem>>, vector<1x8x1xi32>
    %150 = vector.shape_cast %149 : vector<1x8x1xi32> to vector<8x1xi32>
    %151 = vector.shape_cast %148 : vector<8x1xi32> to vector<1x8x1xi32>
    tpu.vector_store %arg8[%c1, %c0_37, %c0_38], %151 {strides = array<i32>} : memref<3x8x1xi32, #tpu.memory_space<vmem>>, vector<1x8x1xi32>,
    %152 = vector.broadcast %142 : vector<8x1xf32> to vector<8x128xf32>
    %153 = arith.subf %140, %152 : vector<8x128xf32>
    %154 = math.exp %153 : vector<8x128xf32>
    %cst_39 = arith.constant dense<0.000000e+00> : vector<8xf32>
    %155 = vector.multi_reduction <add>, %154, %cst_39 [1] : vector<8x128xf32> to vector<8xf32>
    %156 = vector.shape_cast %155 : vector<8xf32> to vector<8x1xf32>
    %157 = vector.broadcast %156 : vector<8x1xf32> to vector<8x128xf32>
    %158 = arith.divf %154, %157 : vector<8x128xf32>
    %159 = arith.truncf %100 : vector<8x128xf32> to vector<8x128xbf16>
    %c0_40 = arith.constant 0 : index
    %c0_41 = arith.constant 0 : index
    %160 = vector.load %arg6[%c0_40, %c0_41] : memref<128x768xbf16, #tpu.memory_space<vmem>>, vector<128x768xbf16>
    %cst_42 = arith.constant dense<0.000000e+00> : vector<8x768xf32>
    %161 = tpu.matmul %159, %160, %cst_42 {dimension_numbers = #tpu.dot_dimension_numbers<[1], [0], [0], [1], [0, 0, 1, 1], [], []>} : vector<8x128xbf16>, vector<128x768xbf16>, vector<8x768xf32> -> vector<8x768xf32>
    %162 = vector.extract_strided_slice %158 {offsets = [0, 6], sizes = [8, 1], strides = [1, 1]} : vector<8x128xf32> to vector<8x1xf32>
    %163 = vector.broadcast %162 : vector<8x1xf32> to vector<8x128xf32>
    %164 = arith.mulf %100, %163 : vector<8x128xf32>
    %165 = vector.extract_strided_slice %161 {offsets = [0, 0], sizes = [8, 128], strides = [1, 1]} : vector<8x768xf32> to vector<8x128xf32>
    %166 = vector.extract_strided_slice %158 {offsets = [0, 0], sizes = [8, 1], strides = [1, 1]} : vector<8x128xf32> to vector<8x1xf32>
    %167 = vector.broadcast %166 : vector<8x1xf32> to vector<8x128xf32>
    %168 = arith.mulf %165, %167 : vector<8x128xf32>
    %169 = arith.addf %164, %168 : vector<8x128xf32>
    %170 = vector.extract_strided_slice %161 {offsets = [0, 128], sizes = [8, 128], strides = [1, 1]} : vector<8x768xf32> to vector<8x128xf32>
    %171 = vector.extract_strided_slice %158 {offsets = [0, 1], sizes = [8, 1], strides = [1, 1]} : vector<8x128xf32> to vector<8x1xf32>
    %172 = vector.broadcast %171 : vector<8x1xf32> to vector<8x128xf32>
    %173 = arith.mulf %170, %172 : vector<8x128xf32>
    %174 = arith.addf %169, %173 : vector<8x128xf32>
    %175 = vector.extract_strided_slice %161 {offsets = [0, 256], sizes = [8, 128], strides = [1, 1]} : vector<8x768xf32> to vector<8x128xf32>
    %176 = vector.extract_strided_slice %158 {offsets = [0, 2], sizes = [8, 1], strides = [1, 1]} : vector<8x128xf32> to vector<8x1xf32>
    %177 = vector.broadcast %176 : vector<8x1xf32> to vector<8x128xf32>
    %178 = arith.mulf %175, %177 : vector<8x128xf32>
    %179 = arith.addf %174, %178 : vector<8x128xf32>
    %180 = vector.extract_strided_slice %161 {offsets = [0, 384], sizes = [8, 128], strides = [1, 1]} : vector<8x768xf32> to vector<8x128xf32>
    %181 = vector.extract_strided_slice %158 {offsets = [0, 3], sizes = [8, 1], strides = [1, 1]} : vector<8x128xf32> to vector<8x1xf32>
    %182 = vector.broadcast %181 : vector<8x1xf32> to vector<8x128xf32>
    %183 = arith.mulf %180, %182 : vector<8x128xf32>
    %184 = arith.addf %179, %183 : vector<8x128xf32>
    %185 = vector.extract_strided_slice %161 {offsets = [0, 512], sizes = [8, 128], strides = [1, 1]} : vector<8x768xf32> to vector<8x128xf32>
    %186 = vector.extract_strided_slice %158 {offsets = [0, 4], sizes = [8, 1], strides = [1, 1]} : vector<8x128xf32> to vector<8x1xf32>
    %187 = vector.broadcast %186 : vector<8x1xf32> to vector<8x128xf32>
    %188 = arith.mulf %185, %187 : vector<8x128xf32>
    %189 = arith.addf %184, %188 : vector<8x128xf32>
    %190 = vector.extract_strided_slice %161 {offsets = [0, 640], sizes = [8, 128], strides = [1, 1]} : vector<8x768xf32> to vector<8x128xf32>
    %191 = vector.extract_strided_slice %158 {offsets = [0, 5], sizes = [8, 1], strides = [1, 1]} : vector<8x128xf32> to vector<8x1xf32>
    %192 = vector.broadcast %191 : vector<8x1xf32> to vector<8x128xf32>
    %193 = arith.mulf %190, %192 : vector<8x128xf32>
    %194 = arith.addf %189, %193 : vector<8x128xf32>
    %195 = vector.broadcast %148 : vector<8x1xi32> to vector<8x128xi32>
    %196 = arith.cmpi eq, %3, %195 : vector<8x128xi32>
    %197 = arith.extui %196 : vector<8x128xi1> to vector<8x128xi32>
    %198 = arith.sitofp %197 : vector<8x128xi32> to vector<8x128xf32>
    %199 = arith.truncf %198 : vector<8x128xf32> to vector<8x128xbf16>
    %c0_43 = arith.constant 0 : index
    %c0_44 = arith.constant 0 : index
    %200 = vector.load %arg3[%c0_43, %c0_44] : memref<128x256xbf16, #tpu.memory_space<vmem>>, vector<128x256xbf16>
    %cst_45 = arith.constant dense<0.000000e+00> : vector<8x256xf32>
    %201 = tpu.matmul %199, %200, %cst_45 {dimension_numbers = #tpu.dot_dimension_numbers<[1], [0], [0], [1], [0, 0, 1, 1], [], []>} : vector<8x128xbf16>, vector<128x256xbf16>, vector<8x256xf32> -> vector<8x256xf32>
    %202 = vector.extract_strided_slice %201 {offsets = [0, 0], sizes = [8, 128], strides = [1, 1]} : vector<8x256xf32> to vector<8x128xf32>
    %203 = vector.extract_strided_slice %201 {offsets = [0, 128], sizes = [8, 128], strides = [1, 1]} : vector<8x256xf32> to vector<8x128xf32>
    %204 = vector.extract_strided_slice %2 {offsets = [0, 0], sizes = [8, 128], strides = [1, 1]} : vector<16x256xf32> to vector<8x128xf32>
    %205 = arith.mulf %202, %204 : vector<8x128xf32>
    %cst_46 = arith.constant dense<0.000000e+00> : vector<8xf32>
    %206 = vector.multi_reduction <add>, %205, %cst_46 [1] : vector<8x128xf32> to vector<8xf32>
    %207 = vector.shape_cast %206 : vector<8xf32> to vector<8x1xf32>
    %208 = vector.extract_strided_slice %2 {offsets = [8, 0], sizes = [8, 128], strides = [1, 1]} : vector<16x256xf32> to vector<8x128xf32>
    %209 = arith.mulf %202, %208 : vector<8x128xf32>
    %cst_47 = arith.constant dense<0.000000e+00> : vector<8xf32>
    %210 = vector.multi_reduction <add>, %209, %cst_47 [1] : vector<8x128xf32> to vector<8xf32>
    %211 = vector.shape_cast %210 : vector<8xf32> to vector<8x1xf32>
    %212 = arith.maximumf %207, %211 : vector<8x1xf32>
    %213 = arith.subf %207, %212 : vector<8x1xf32>
    %214 = math.exp %213 : vector<8x1xf32>
    %215 = arith.subf %211, %212 : vector<8x1xf32>
    %216 = math.exp %215 : vector<8x1xf32>
    %217 = arith.addf %214, %216 : vector<8x1xf32>
    %cst_48 = arith.constant 1.000000e+00 : f32
    %218 = vector.broadcast %cst_48 : f32 to vector<8x1xf32>
    %219 = arith.divf %218, %217 : vector<8x1xf32>
    %220 = vector.extract_strided_slice %2 {offsets = [0, 128], sizes = [8, 128], strides = [1, 1]} : vector<16x256xf32> to vector<8x128xf32>
    %221 = arith.mulf %214, %219 : vector<8x1xf32>
    %222 = vector.broadcast %221 : vector<8x1xf32> to vector<8x128xf32>
    %223 = arith.mulf %222, %220 : vector<8x128xf32>
    %224 = vector.extract_strided_slice %2 {offsets = [8, 128], sizes = [8, 128], strides = [1, 1]} : vector<16x256xf32> to vector<8x128xf32>
    %225 = arith.mulf %216, %219 : vector<8x1xf32>
    %226 = vector.broadcast %225 : vector<8x1xf32> to vector<8x128xf32>
    %227 = arith.mulf %226, %224 : vector<8x128xf32>
    %228 = arith.addf %223, %227 : vector<8x128xf32>
    %229 = arith.truncf %228 : vector<8x128xf32> to vector<8x128xbf16>
    %c0_49 = arith.constant 0 : index
    %c0_50 = arith.constant 0 : index
    %230 = vector.load %arg4[%c0_49, %c0_50] : memref<128x128xbf16, #tpu.memory_space<vmem>>, vector<128x128xbf16>
    %cst_51 = arith.constant dense<0.000000e+00> : vector<8x128xf32>
    %231 = tpu.matmul %229, %230, %cst_51 {dimension_numbers = #tpu.dot_dimension_numbers<[1], [0], [0], [1], [0, 0, 1, 1], [], []>} : vector<8x128xbf16>, vector<128x128xbf16>, vector<8x128xf32> -> vector<8x128xf32>
    %232 = arith.addf %231, %203 : vector<8x128xf32>
    %233 = vector.broadcast %4 : vector<1x128xf32> to vector<8x128xf32>
    %234 = arith.addf %232, %233 : vector<8x128xf32>
    %cst_52 = arith.constant dense<0xFF800000> : vector<8xf32>
    %235 = vector.multi_reduction <maximumf>, %234, %cst_52 [1] : vector<8x128xf32> to vector<8xf32>
    %236 = vector.shape_cast %235 : vector<8xf32> to vector<8x1xf32>
    %237 = vector.broadcast %236 : vector<8x1xf32> to vector<8x128xf32>
    %238 = arith.cmpf oge, %234, %237 : vector<8x128xf32>
    %c128_i32_53 = arith.constant 128 : i32
    %239 = vector.broadcast %c128_i32_53 : i32 to vector<8x128xi32>
    %240 = arith.select %238, %3, %239 : vector<8x128xi1>, vector<8x128xi32>
    %cst_54 = arith.constant dense<2147483647> : vector<8xi32>
    %241 = vector.multi_reduction <minsi>, %240, %cst_54 [1] : vector<8x128xi32> to vector<8xi32>
    %242 = vector.shape_cast %241 : vector<8xi32> to vector<8x1xi32>
    %c2 = arith.constant 2 : index
    %c0_55 = arith.constant 0 : index
    %c0_56 = arith.constant 0 : index
    %243 = vector.load %arg8[%c2, %c0_55, %c0_56] : memref<3x8x1xi32, #tpu.memory_space<vmem>>, vector<1x8x1xi32>
    %244 = vector.shape_cast %243 : vector<1x8x1xi32> to vector<8x1xi32>
    %245 = vector.shape_cast %242 : vector<8x1xi32> to vector<1x8x1xi32>
    tpu.vector_store %arg8[%c2, %c0_55, %c0_56], %245 {strides = array<i32>} : memref<3x8x1xi32, #tpu.memory_space<vmem>>, vector<1x8x1xi32>,
    %246 = vector.broadcast %236 : vector<8x1xf32> to vector<8x128xf32>
    %247 = arith.subf %234, %246 : vector<8x128xf32>
    %248 = math.exp %247 : vector<8x128xf32>
    %cst_57 = arith.constant dense<0.000000e+00> : vector<8xf32>
    %249 = vector.multi_reduction <add>, %248, %cst_57 [1] : vector<8x128xf32> to vector<8xf32>
    %250 = vector.shape_cast %249 : vector<8xf32> to vector<8x1xf32>
    %251 = vector.broadcast %250 : vector<8x1xf32> to vector<8x128xf32>
    %252 = arith.divf %248, %251 : vector<8x128xf32>
    %253 = arith.truncf %194 : vector<8x128xf32> to vector<8x128xbf16>
    %c0_58 = arith.constant 0 : index
    %c0_59 = arith.constant 0 : index
    %254 = vector.load %arg6[%c0_58, %c0_59] : memref<128x768xbf16, #tpu.memory_space<vmem>>, vector<128x768xbf16>
    %cst_60 = arith.constant dense<0.000000e+00> : vector<8x768xf32>
    %255 = tpu.matmul %253, %254, %cst_60 {dimension_numbers = #tpu.dot_dimension_numbers<[1], [0], [0], [1], [0, 0, 1, 1], [], []>} : vector<8x128xbf16>, vector<128x768xbf16>, vector<8x768xf32> -> vector<8x768xf32>
    %256 = vector.extract_strided_slice %252 {offsets = [0, 6], sizes = [8, 1], strides = [1, 1]} : vector<8x128xf32> to vector<8x1xf32>
    %257 = vector.broadcast %256 : vector<8x1xf32> to vector<8x128xf32>
    %258 = arith.mulf %194, %257 : vector<8x128xf32>
    %259 = vector.extract_strided_slice %255 {offsets = [0, 0], sizes = [8, 128], strides = [1, 1]} : vector<8x768xf32> to vector<8x128xf32>
    %260 = vector.extract_strided_slice %252 {offsets = [0, 0], sizes = [8, 1], strides = [1, 1]} : vector<8x128xf32> to vector<8x1xf32>
    %261 = vector.broadcast %260 : vector<8x1xf32> to vector<8x128xf32>
    %262 = arith.mulf %259, %261 : vector<8x128xf32>
    %263 = arith.addf %258, %262 : vector<8x128xf32>
    %264 = vector.extract_strided_slice %255 {offsets = [0, 128], sizes = [8, 128], strides = [1, 1]} : vector<8x768xf32> to vector<8x128xf32>
    %265 = vector.extract_strided_slice %252 {offsets = [0, 1], sizes = [8, 1], strides = [1, 1]} : vector<8x128xf32> to vector<8x1xf32>
    %266 = vector.broadcast %265 : vector<8x1xf32> to vector<8x128xf32>
    %267 = arith.mulf %264, %266 : vector<8x128xf32>
    %268 = arith.addf %263, %267 : vector<8x128xf32>
    %269 = vector.extract_strided_slice %255 {offsets = [0, 256], sizes = [8, 128], strides = [1, 1]} : vector<8x768xf32> to vector<8x128xf32>
    %270 = vector.extract_strided_slice %252 {offsets = [0, 2], sizes = [8, 1], strides = [1, 1]} : vector<8x128xf32> to vector<8x1xf32>
    %271 = vector.broadcast %270 : vector<8x1xf32> to vector<8x128xf32>
    %272 = arith.mulf %269, %271 : vector<8x128xf32>
    %273 = arith.addf %268, %272 : vector<8x128xf32>
    %274 = vector.extract_strided_slice %255 {offsets = [0, 384], sizes = [8, 128], strides = [1, 1]} : vector<8x768xf32> to vector<8x128xf32>
    %275 = vector.extract_strided_slice %252 {offsets = [0, 3], sizes = [8, 1], strides = [1, 1]} : vector<8x128xf32> to vector<8x1xf32>
    %276 = vector.broadcast %275 : vector<8x1xf32> to vector<8x128xf32>
    %277 = arith.mulf %274, %276 : vector<8x128xf32>
    %278 = arith.addf %273, %277 : vector<8x128xf32>
    %279 = vector.extract_strided_slice %255 {offsets = [0, 512], sizes = [8, 128], strides = [1, 1]} : vector<8x768xf32> to vector<8x128xf32>
    %280 = vector.extract_strided_slice %252 {offsets = [0, 4], sizes = [8, 1], strides = [1, 1]} : vector<8x128xf32> to vector<8x1xf32>
    %281 = vector.broadcast %280 : vector<8x1xf32> to vector<8x128xf32>
    %282 = arith.mulf %279, %281 : vector<8x128xf32>
    %283 = arith.addf %278, %282 : vector<8x128xf32>
    %284 = vector.extract_strided_slice %255 {offsets = [0, 640], sizes = [8, 128], strides = [1, 1]} : vector<8x768xf32> to vector<8x128xf32>
    %285 = vector.extract_strided_slice %252 {offsets = [0, 5], sizes = [8, 1], strides = [1, 1]} : vector<8x128xf32> to vector<8x1xf32>
    %286 = vector.broadcast %285 : vector<8x1xf32> to vector<8x128xf32>
    %287 = arith.mulf %284, %286 : vector<8x128xf32>
    %288 = arith.addf %283, %287 : vector<8x128xf32>
    %cst_61 = arith.constant dense<0.000000e+00> : vector<8xf32>
    %289 = vector.multi_reduction <add>, %288, %cst_61 [1] : vector<8x128xf32> to vector<8xf32>
    %290 = vector.shape_cast %289 : vector<8xf32> to vector<8x1xf32>
    %cst_62 = arith.constant 9.99999968E-21 : f32
    %291 = vector.broadcast %cst_62 : f32 to vector<8x1xf32>
    %292 = arith.maximumf %291, %290 : vector<8x1xf32>
    %293 = vector.broadcast %292 : vector<8x1xf32> to vector<8x128xf32>
    %294 = arith.divf %288, %293 : vector<8x128xf32>
    %c0_63 = arith.constant 0 : index
    %c0_64 = arith.constant 0 : index
    %295 = vector.load %arg9[%c0_63, %c0_64] : memref<8x128xf32, #tpu.memory_space<vmem>>, vector<8x128xf32>
    tpu.vector_store %arg9[%c0_63, %c0_64], %294 {strides = array<i32>} : memref<8x128xf32, #tpu.memory_space<vmem>>, vector<8x128xf32>,
    return
  }
  func.func @transform_0(%arg0: i32) -> (i32, i32) {
    %c0_i32 = arith.constant 0 : i32
    %c0_i32_0 = arith.constant 0 : i32
    %c0_i32_1 = arith.constant 0 : i32
    return %c0_i32, %c0_i32_0 : i32, i32
  }
  func.func @transform_1(%arg0: i32) -> (i32, i32) {
    %c0_i32 = arith.constant 0 : i32
    %c0_i32_0 = arith.constant 0 : i32
    %c0_i32_1 = arith.constant 0 : i32
    return %c0_i32, %c0_i32_0 : i32, i32
  }
  func.func @transform_2(%arg0: i32) -> (i32, i32) {
    %c0_i32 = arith.constant 0 : i32
    %c0_i32_0 = arith.constant 0 : i32
    %c0_i32_1 = arith.constant 0 : i32
    return %c0_i32, %c0_i32_0 : i32, i32
  }
  func.func @transform_3(%arg0: i32) -> (i32, i32) {
    %c0_i32 = arith.constant 0 : i32
    %c0_i32_0 = arith.constant 0 : i32
    %c0_i32_1 = arith.constant 0 : i32
    return %c0_i32, %c0_i32_0 : i32, i32
  }
  func.func @transform_4(%arg0: i32) -> (i32, i32) {
    %c0_i32 = arith.constant 0 : i32
    %c0_i32_0 = arith.constant 0 : i32
    %c0_i32_1 = arith.constant 0 : i32
    return %c0_i32, %c0_i32_0 : i32, i32
  }
  func.func @transform_5(%arg0: i32) -> (i32, i32) {
    %c0_i32 = arith.constant 0 : i32
    %c0_i32_0 = arith.constant 0 : i32
    %c0_i32_1 = arith.constant 0 : i32
    return %c0_i32, %c0_i32_0 : i32, i32
  }
  func.func @transform_6(%arg0: i32) -> (i32, i32) {
    %c0_i32 = arith.constant 0 : i32
    %c0_i32_0 = arith.constant 0 : i32
    %c0_i32_1 = arith.constant 0 : i32
    return %c0_i32, %c0_i32_0 : i32, i32
  }
  func.func @transform_7(%arg0: i32) -> (i32, i32, i32) {
    %c0_i32 = arith.constant 0 : i32
    %c0_i32_0 = arith.constant 0 : i32
    %c0_i32_1 = arith.constant 0 : i32
    %c0_i32_2 = arith.constant 0 : i32
    return %c0_i32, %c0_i32_0, %c0_i32_1 : i32, i32, i32
  }
  func.func @transform_8(%arg0: i32) -> (i32, i32) {
    %c0_i32 = arith.constant 0 : i32
    %c0_i32_0 = arith.constant 0 : i32
    %c0_i32_1 = arith.constant 0 : i32
    return %c0_i32, %c0_i32_0 : i32, i32
  }
}

</mosaic_0001>

<bundles_post_ra>
// kernel: translator_forward.1
= control target key start
LH: loop header
LB: loop body
LE: loop exit
PB: predicated region body
PF: predicated region fallthrough
CT: control target
= control target key end

     0   :  { %v3084_v1 = vmov 0   ;;  %v176_v27 = vlaneseq  ;;  %v3085_v36 = vmov 1.0|1.0   ;;  %v3086_v48 = vmov 0.0   ;;  %s4044_s1 = inlined_call_operand.vmem [shape: bf16[128,256], index: 1, kind: input, shape index: {}]   ;;  %s4045_s2 = inlined_call_operand.vmem [shape: bf16[128,256], index: 2, kind: input, shape index: {}]   ;;  %s4046_s0 = inlined_call_operand.vmem [shape: bf16[16,128], index: 0, kind: input, shape index: {}]   ;;  %s4047_s3 = inlined_call_operand.vmem [shape: bf16[128,128], index: 3, kind: input, shape index: {}]   ;;  %s4048_s4 = inlined_call_operand.vmem [shape: f32[1,128], index: 4, kind: input, shape index: {}]   ;;  %s4049_s5 = inlined_call_operand.vmem [shape: bf16[128,768], index: 5, kind: input, shape index: {}]   ;;  %s4050_s6 = inlined_call_operand.vmem [shape: f32[8,128], index: 6, kind: input, shape index: {}]   ;;  %s4051_s7 = inlined_call_operand.vmem [shape: s32[3,8,1], index: 7, kind: output, shape index: {0}]   ;;  %s4052_s8 = inlined_call_operand.vmem [shape: f32[8,128], index: 8, kind: output, shape index: {1}]  }
   0x1   :  { %v2810_v0 = vld [vmem:[%s4044_s1 + $0x4] ss:$8 sps:$4 sm:$0xff]   ;;  %165 = vmatprep.mubr.bf16.mxu0 %v3084_v1  ;;  %312 = vmatprep.mubr.bf16.mxu1 %v3084_v1  ;;  %v2814_v3 = vld [vmem:[%s4044_s1] ss:$8 sps:$4 sm:$0xff]   ;;  %v2816_v5 = vld [vmem:[%s4044_s1 + $0x14] ss:$8 sps:$4 sm:$0xff]  }
   0x2   :  { %v3147_v2 = vld [vmem:[%s4045_s2 + $0x4] ss:$8 sps:$4 sm:$0xff]   ;;  %2790 = vset.pattern.permute.xlu1 %v3084_v1  ;;  %133 = vmatprep.subr.bf16.mxu0 %v2810_v0  ;;  %v3156_v4 = vld [vmem:[%s4045_s2] ss:$8 sps:$4 sm:$0xff]   ;;  %v3166_v6 = vld [vmem:[%s4045_s2 + $0x14] ss:$8 sps:$4 sm:$0xff]  }
   0x3   :  { %280 = vmatprep.subr.bf16.mxu1 %v3147_v2  ;;  %134 = vmatpush1.bf16.msra.mxu0 %v2814_v3  ;;  %v2820_v7 = vld [vmem:[%s4044_s1 + $0x10] ss:$8 sps:$4 sm:$0xff]   ;;  %v2822_v9 = vld [vmem:[%s4044_s1 + $0x24] ss:$8 sps:$4 sm:$0xff]   ;;  %v2826_v11 = vld [vmem:[%s4044_s1 + $0x20] ss:$8 sps:$4 sm:$0xff]  }
   0x4   :  { %281 = vmatpush1.bf16.msra.mxu1 %v3156_v4  ;;  %135 = vmatprep.subr.bf16.mxu0 %v2816_v5  ;;  %v3174_v8 = vld [vmem:[%s4045_s2 + $0x10] ss:$8 sps:$4 sm:$0xff]   ;;  %v3183_v10 = vld [vmem:[%s4045_s2 + $0x24] ss:$8 sps:$4 sm:$0xff]   ;;  %v3191_v12 = vld [vmem:[%s4045_s2 + $0x20] ss:$8 sps:$4 sm:$0xff]  }
   0x5   :  { %282 = vmatprep.subr.bf16.mxu1 %v3166_v6  ;;  %v2828_v13 = vld [vmem:[%s4044_s1 + $0x34] ss:$8 sps:$4 sm:$0xff]   ;;  %v2832_v15 = vld [vmem:[%s4044_s1 + $0x30] ss:$8 sps:$4 sm:$0xff]   ;;  %v2834_v17 = vld [vmem:[%s4044_s1 + $0x44] ss:$8 sps:$4 sm:$0xff]  }
   0x6   :  { %v3201_v14 = vld [vmem:[%s4045_s2 + $0x34] ss:$8 sps:$4 sm:$0xff]   ;;  %v3210_v16 = vld [vmem:[%s4045_s2 + $0x30] ss:$8 sps:$4 sm:$0xff]   ;;  %v3219_v18 = vld [vmem:[%s4045_s2 + $0x44] ss:$8 sps:$4 sm:$0xff]  }
   0x7   :  { %136 = vmatpush1.bf16.msra.mxu0 %v2820_v7  ;;  %v2838_v19 = vld [vmem:[%s4044_s1 + $0x40] ss:$8 sps:$4 sm:$0xff]   ;;  %v2840_v21 = vld [vmem:[%s4044_s1 + $0x54] ss:$8 sps:$4 sm:$0xff]   ;;  %v2844_v23 = vld [vmem:[%s4044_s1 + $0x50] ss:$8 sps:$4 sm:$0xff]  }
   0x8   :  { %283 = vmatpush1.bf16.msra.mxu1 %v3174_v8  ;;  %137 = vmatprep.subr.bf16.mxu0 %v2822_v9  ;;  %v3227_v20 = vld [vmem:[%s4045_s2 + $0x40] ss:$8 sps:$4 sm:$0xff]   ;;  %v3237_v22 = vld [vmem:[%s4045_s2 + $0x54] ss:$8 sps:$4 sm:$0xff]   ;;  %v3246_v24 = vld [vmem:[%s4045_s2 + $0x50] ss:$8 sps:$4 sm:$0xff]  }
   0x9   :  { %284 = vmatprep.subr.bf16.mxu1 %v3183_v10  ;;  %v2846_v25 = vld [vmem:[%s4044_s1 + $0x64] ss:$8 sps:$4 sm:$0xff]   ;;  %v2850_v28 = vld [vmem:[%s4044_s1 + $0x60] ss:$8 sps:$4 sm:$0xff]   ;;  %v2852_v30 = vld [vmem:[%s4044_s1 + $0x74] ss:$8 sps:$4 sm:$0xff]  }
   0xa   :  { %v3255_v26 = vld [vmem:[%s4045_s2 + $0x64] ss:$8 sps:$4 sm:$0xff]   ;;  %v3263_v29 = vld [vmem:[%s4045_s2 + $0x60] ss:$8 sps:$4 sm:$0xff]   ;;  %v3271_v31 = vld [vmem:[%s4045_s2 + $0x74] ss:$8 sps:$4 sm:$0xff]  }
   0xb   :  { %138 = vmatpush1.bf16.msra.mxu0 %v2826_v11  ;;  %v3275_v32 = vand.u32 127, %v176_v27  ;;  %v2856_v33 = vld [vmem:[%s4044_s1 + $0x70] ss:$8 sps:$4 sm:$0xff]   ;;  %v2858_v35 = vld [vmem:[%s4046_s0] sm:$0xff]   ;;  %v2860_v49 = vld [vmem:[%s4047_s3 + $0x8] sm:$0xff]   ;;  %vm3087_vm2 = vmmov 0  }
   0xc   :  { %285 = vmatpush1.bf16.msra.mxu1 %v3191_v12  ;;  %139 = vmatprep.subr.bf16.mxu0 %v2828_v13  ;;  %v3284_v34 = vld [vmem:[%s4045_s2 + $0x70] ss:$8 sps:$4 sm:$0xff]   ;;  %v2859_v47 = vld [vmem:[%s4047_s3] sm:$0xff]   ;;  %v2864_v53 = vld [vmem:[%s4047_s3 + $0x28] sm:$0xff]   ;;  %vm472_vm5 = vcmask 7168  }
   0xd   :  { %286 = vmatprep.subr.bf16.mxu1 %v3201_v14  ;;  %vm180_vm0 = vcmp.eq.s32.totalorder %v3275_v32, 0  ;;  %v2861_v50 = vld [vmem:[%s4047_s3 + $0x10] sm:$0xff]   ;;  %v2862_v51 = vld [vmem:[%s4047_s3 + $0x18] sm:$0xff]   ;;  %v2863_v52 = vld [vmem:[%s4047_s3 + $0x20] sm:$0xff]  }
   0xe   :  { %vm2481_vm1 = vmpackc.low %vm180_vm0, %vm180_vm0  ;;  %v2865_v54 = vld [vmem:[%s4047_s3 + $0x30] sm:$0xff]   ;;  %v2866_v55 = vld [vmem:[%s4047_s3 + $0x38] sm:$0xff]  }
   0xf   :  { %140 = vmatpush1.bf16.msra.mxu0 %v2832_v15 }
  0x10   :  { %287 = vmatpush1.bf16.msra.mxu1 %v3210_v16  ;;  %141 = vmatprep.subr.bf16.mxu0 %v2834_v17 }
  0x11   :  { %288 = vmatprep.subr.bf16.mxu1 %v3219_v18 }
  0x13   :  { %142 = vmatpush1.bf16.msra.mxu0 %v2838_v19  ;;  %v3344_v19 = vld [vmem:[%s4048_s4] ss:$0 sm:$0xff] }
  0x14   :  { %289 = vmatpush1.bf16.msra.mxu1 %v3227_v20  ;;  %143 = vmatprep.subr.bf16.mxu0 %v2840_v21 }
  0x15   :  { %290 = vmatprep.subr.bf16.mxu1 %v3237_v22 }
  0x17   :  { %144 = vmatpush1.bf16.msra.mxu0 %v2844_v23 }
  0x18   :  { %291 = vmatpush1.bf16.msra.mxu1 %v3246_v24  ;;  %145 = vmatprep.subr.bf16.mxu0 %v2846_v25 }
  0x19   :  { %292 = vmatprep.subr.bf16.mxu1 %v3255_v26 }
  0x1b   :  { %146 = vmatpush1.bf16.msra.mxu0 %v2850_v28 }
  0x1c   :  { %293 = vmatpush1.bf16.msra.mxu1 %v3263_v29  ;;  %147 = vmatprep.subr.bf16.mxu0 %v2852_v30 }
  0x1d   :  { %294 = vmatprep.subr.bf16.mxu1 %v3271_v31 }
  0x1f   :  { %148 = vmatpush1.bf16.msra.mxu0 %v2856_v33 }
  0x20   :  { %295 = vmatpush1.bf16.msra.mxu1 %v3284_v34  ;;  %2719 = vmatprep.subr.bf16.mxu0 %v3086_v48 }
  0x22   :  { %166 = vmatmul.mubr.bf16.vlgmr.msra.gmra.mrb[0].mxu0 %v2858_v35 }
  0x23   :  { %2482 = vmatmul.mubr.msk.bf16.vlgmr.msra.gmra.mrb[0].mxu1 %vm2481_vm1, %v3085_v36  ;;  %2720 = vmatpush3.bf16.msra.mxu0 %v2859_v47  ;;  %v3381_v47 = vld [vmem:[%s4049_s5 + $0x6c] ss:$24 sps:$4 sm:$0xff]  }
  0x24   :  { %802 = vmatprep.mubr.bf16.mxu1 %v3084_v1  ;;  %2721 = vmatprep.subr.bf16.mxu0 %v3086_v48 }
  0x25   :  { %2735 = vmatprep.mubr.msk.bf16.mxu0 %vm3087_vm2, %v3086_v48 }
  0x27   :  { %2722 = vmatpush3.bf16.msra.mxu0 %v2860_v49  ;;  %v3387_v49 = vld [vmem:[%s4049_s5 + $0x68] ss:$24 sps:$4 sm:$0xff]  }
  0x28   :  { %2723 = vmatprep.subr.bf16.mxu0 %v3086_v48 }
  0x2b   :  { %2724 = vmatpush3.bf16.msra.mxu0 %v2861_v50  ;;  %v3393_v50 = vld [vmem:[%s4049_s5 + $0x9c] ss:$24 sps:$4 sm:$0xff]  }
  0x2c   :  { %2725 = vmatprep.subr.bf16.mxu0 %v3086_v48 }
  0x2f   :  { %2726 = vmatpush3.bf16.msra.mxu0 %v2862_v51  ;;  %v3398_v51 = vld [vmem:[%s4049_s5 + $0x98] ss:$24 sps:$4 sm:$0xff]  }
  0x30   :  { %2727 = vmatprep.subr.bf16.mxu0 %v3086_v48 }
  0x33   :  { %2728 = vmatpush3.bf16.msra.mxu0 %v2863_v52  ;;  %v3403_v52 = vld [vmem:[%s4049_s5 + $0xcc] ss:$24 sps:$4 sm:$0xff]  }
  0x34   :  { %2729 = vmatprep.subr.bf16.mxu0 %v3086_v48 }
  0x37   :  { %2730 = vmatpush3.bf16.msra.mxu0 %v2864_v53  ;;  %v3410_v53 = vld [vmem:[%s4049_s5 + $0xc8] ss:$24 sps:$4 sm:$0xff]  }
  0x38   :  { %2731 = vmatprep.subr.bf16.mxu0 %v3086_v48 }
  0x3b   :  { %2732 = vmatpush3.bf16.msra.mxu0 %v2865_v54  ;;  %v3415_v54 = vld [vmem:[%s4049_s5 + $0xfc] ss:$24 sps:$4 sm:$0xff]  }
  0x3c   :  { %2733 = vmatprep.subr.bf16.mxu0 %v3086_v48 }
  0x3f   :  { %2734 = vmatpush3.bf16.msra.mxu0 %v2866_v55  ;;  %v3422_v55 = vld [vmem:[%s4049_s5 + $0xf8] ss:$24 sps:$4 sm:$0xff]  }
  0xf5   :  { %v3294_v37 = vpop.f32.mrb[0].mxu0 }
  0xf6   :  { %v314_v38 = vpop.f32.mrb[0].mxu1  ;;  %v3296_v39 = vpop.f32.mrb[1].mxu0 }
  0xf7   :  { %v316_v40 = vpop.f32.mrb[1].mxu1  ;;  %v321_v41 = vmul.f32 %v314_v38, %v3294_v37  ;;  %v3299_v42 = vpop.f32.mrb[2].mxu0 }
  0xf8   :  { %v318_v43 = vpop.f32.mrb[2].mxu1  ;;  %v3301_v45 = vpop.f32.mrb[3].mxu0  ;;  %v324_v46 = vmul.f32 %v314_v38, %v3299_v42 }
  0xf9   :  { %v319_v44 = vpop.f32.mrb[3].mxu1  ;;  %322 = vadd.xlane.f32.xlu0 %v321_v41  ;;  %v3363_v43 = vld [vmem:[%s4049_s5 + $0xc] ss:$24 sps:$4 sm:$0xff]  }
  0xfa   :  { %v3368_v44 = vld [vmem:[%s4049_s5 + $0x3c] ss:$24 sps:$4 sm:$0xff]   ;;  %811 = vmatprep.subr.bf16.mxu0 %v3363_v43 }
  0xfd   :  { %325 = vadd.xlane.f32.xlu0 %v324_v46  ;;  %v3375_v46 = vld [vmem:[%s4049_s5 + $0x38] ss:$24 sps:$4 sm:$0xff]  }
 0x186   :  { %v323_v56 = vpop.xlane.xlu0 %322 }
 0x18a   :  { %v326_v57 = vpop.xlane.xlu0 %325 }
 0x18b   :  { %v327_v58 = vmax.f32 %v323_v56, %v326_v57 }
 0x18d   :  { %v328_v59 = vsub.f32 %v323_v56, %v327_v58  ;;  %v331_v60 = vsub.f32 %v326_v57, %v327_v58  ;;  %v3427_v56 = vld [vmem:[%s4049_s5 + $0x12c] ss:$24 sps:$4 sm:$0xff]   ;;  %v3434_v57 = vld [vmem:[%s4049_s5 + $0x128] ss:$24 sps:$4 sm:$0xff]   ;;  %v3439_v58 = vld [vmem:[%s4049_s5 + $0x15c] ss:$24 sps:$4 sm:$0xff]  }
 0x18f   :  { %v329_v61 = vmul.f32 1.442695, %v328_v59  ;;  %v332_v62 = vmul.f32 1.442695, %v331_v60  ;;  %v3446_v59 = vld [vmem:[%s4049_s5 + $0x158] ss:$24 sps:$4 sm:$0xff]  }
 0x190   :  { %v3451_v60 = vld [vmem:[%s4050_s6] sm:$0xff] }
 0x191   :  { %3051 = vpow2.f32 %v329_v61  ;;  %v3457_v61 = vpack.c.bf16 %v3451_v60, %v3451_v60 }
 0x192   :  { %3053 = vpow2.f32 %v332_v62  ;;  %v2894_v62 = vld [vmem:[%s4049_s5 + $0x30] ss:$24 sps:$4 sm:$0xff]  }
 0x19b   :  { %v3052_v63 = vpop.eup %3051 }
 0x19c   :  { %v3054_v0 = vpop.eup %3053 }
 0x19d   :  { %v334_v3 = vadd.f32 %v3054_v0, %v3052_v63 }
 0x19f   :  { %3055 = vrcp.f32 %v334_v3  ;;  %v2902_v3 = vld [vmem:[%s4049_s5 + $0x94] ss:$24 sps:$4 sm:$0xff]  }
 0x1a9   :  { %v3056_v5 = vpop.eup %3055 }
 0x1aa   :  { %v337_v7 = vmul.f32 %v3056_v5, %v3052_v63  ;;  %v339_v9 = vmul.f32 %v3056_v5, %v3054_v0  ;;  %v2899_v63 = vld [vmem:[%s4049_s5 + $0x64] ss:$24 sps:$4 sm:$0xff]   ;;  %v2897_v0 = vld [vmem:[%s4049_s5 + $0x60] ss:$24 sps:$4 sm:$0xff]   ;;  %v2900_v5 = vld [vmem:[%s4049_s5 + $0x90] ss:$24 sps:$4 sm:$0xff]  }
 0x1ac   :  { %v338_v11 = vmul.f32 %v337_v7, %v3296_v39  ;;  %v340_v13 = vmul.f32 %v339_v9, %v3301_v45  ;;  %v2905_v7 = vld [vmem:[%s4049_s5 + $0xc4] ss:$24 sps:$4 sm:$0xff]   ;;  %v2903_v9 = vld [vmem:[%s4049_s5 + $0xc0] ss:$24 sps:$4 sm:$0xff]  }
 0x1ae   :  { %v341_v15 = vadd.f32 %v340_v13, %v338_v11  ;;  %v2908_v11 = vld [vmem:[%s4049_s5 + $0xf4] ss:$24 sps:$4 sm:$0xff]   ;;  %v2906_v13 = vld [vmem:[%s4049_s5 + $0xf0] ss:$24 sps:$4 sm:$0xff]  }
 0x1b0   :  { %v342_v17 = vpack.c.bf16 %v341_v15, %v341_v15  ;;  %v2911_v15 = vld [vmem:[%s4049_s5 + $0x124] ss:$24 sps:$4 sm:$0xff]  }
 0x1b2   :  { %2736 = vmatmul.mubr.bf16.vlgmr.msra.gmra.mrb[4].mxu0 %v342_v17  ;;  %v2909_v17 = vld [vmem:[%s4049_s5 + $0x120] ss:$24 sps:$4 sm:$0xff]  }
 0x1b3   :  { %843 = vmatprep.mubr.bf16.mxu0 %v3084_v1 }
 0x285   :  { %v441_v21 = vpop.f32.mrb[4].mxu0 }
 0x286   :  { %v442_v23 = vadd.f32 %v441_v21, %v316_v40  ;;  %v2737_v25 = vpop.f32.mrb[5].mxu0  ;;  %v3358_v40 = vld [vmem:[%s4049_s5 + $0x8] ss:$24 sps:$4 sm:$0xff]   ;;  %v2914_v21 = vld [vmem:[%s4049_s5 + $0x154] ss:$24 sps:$4 sm:$0xff]  }
 0x287   :  { %v444_v27 = vpop.f32.mrb[6].mxu0  ;;  %812 = vmatpush1.bf16.msra.mxu0 %v3358_v40  ;;  %v2917_v25 = vld [vmem:[%s4049_s5 + $0x14] ss:$24 sps:$4 sm:$0xff]  }
 0x288   :  { %v3347_v28 = vadd.f32 %v3344_v19, %v442_v23  ;;  %v2738_v30 = vpop.f32.mrb[7].mxu0  ;;  %813 = vmatprep.subr.bf16.mxu0 %v3368_v44  ;;  %v2912_v23 = vld [vmem:[%s4049_s5 + $0x150] ss:$24 sps:$4 sm:$0xff]  }
 0x289   :  { %v3543_v27 = vld [vmem:[%s4049_s5 + $0x10] ss:$24 sps:$4 sm:$0xff]   ;;  %v3548_v30 = vld [vmem:[%s4049_s5 + $0x44] ss:$24 sps:$4 sm:$0xff]  }
 0x28a   :  { %454 = vmax.xlane.f32.xlu1 %v3347_v28 }
 0x28b   :  { %814 = vmatpush1.bf16.msra.mxu0 %v3375_v46 }
 0x28c   :  { %815 = vmatprep.subr.bf16.mxu0 %v3381_v47 }
 0x28f   :  { %816 = vmatpush1.bf16.msra.mxu0 %v3387_v49 }
 0x290   :  { %817 = vmatprep.subr.bf16.mxu0 %v3393_v50 }
 0x293   :  { %818 = vmatpush1.bf16.msra.mxu0 %v3398_v51 }
 0x294   :  { %819 = vmatprep.subr.bf16.mxu0 %v3403_v52 }
 0x297   :  { %820 = vmatpush1.bf16.msra.mxu0 %v3410_v53 }
 0x298   :  { %821 = vmatprep.subr.bf16.mxu0 %v3415_v54 }
 0x29b   :  { %822 = vmatpush1.bf16.msra.mxu0 %v3422_v55 }
 0x29c   :  { %823 = vmatprep.subr.bf16.mxu0 %v3427_v56 }
 0x29f   :  { %824 = vmatpush1.bf16.msra.mxu0 %v3434_v57 }
 0x2a0   :  { %825 = vmatprep.subr.bf16.mxu0 %v3439_v58 }
 0x2a3   :  { %826 = vmatpush1.bf16.msra.mxu0 %v3446_v59 }
 0x2a4   :  { %1035 = vmatprep.subr.bf16.mxu0 %v3147_v2 }
 0x2a6   :  { %844 = vmatmul.mubr.bf16.vlgmr.msra.gmra.mrb[8].mxu0 %v3457_v61 }
 0x2a7   :  { %1036 = vmatpush1.bf16.msra.mxu0 %v3156_v4  ;;  %1067 = vmatprep.mubr.bf16.mxu0 %v3084_v1 }
 0x2a8   :  { %1037 = vmatprep.subr.bf16.mxu0 %v3166_v6 }
 0x2ab   :  { %1038 = vmatpush1.bf16.msra.mxu0 %v3174_v8 }
 0x2ac   :  { %1039 = vmatprep.subr.bf16.mxu0 %v3183_v10 }
 0x2af   :  { %1040 = vmatpush1.bf16.msra.mxu0 %v3191_v12 }
 0x2b0   :  { %1041 = vmatprep.subr.bf16.mxu0 %v3201_v14 }
 0x2b3   :  { %1042 = vmatpush1.bf16.msra.mxu0 %v3210_v16 }
 0x2b4   :  { %1043 = vmatprep.subr.bf16.mxu0 %v3219_v18 }
 0x2b7   :  { %1044 = vmatpush1.bf16.msra.mxu0 %v3227_v20 }
 0x2b8   :  { %1045 = vmatprep.subr.bf16.mxu0 %v3237_v22 }
 0x2bb   :  { %1046 = vmatpush1.bf16.msra.mxu0 %v3246_v24 }
 0x2bc   :  { %1047 = vmatprep.subr.bf16.mxu0 %v3255_v26 }
 0x2bf   :  { %1048 = vmatpush1.bf16.msra.mxu0 %v3263_v29  ;;  %v2891_v29 = vld [vmem:[%s4049_s5] ss:$24 sps:$4 sm:$0xff]  }
 0x2c0   :  { %1049 = vmatprep.subr.bf16.mxu0 %v3271_v31  ;;  %v2893_v31 = vld [vmem:[%s4049_s5 + $0x4] ss:$24 sps:$4 sm:$0xff]  }
 0x2c1   :  { %770 = vmatprep.subr.bf16.mxu1 %v2893_v31 }
 0x2c2   :  { %771 = vmatpush1.bf16.msra.mxu1 %v2891_v29 }
 0x2c3   :  { %1050 = vmatpush1.bf16.msra.mxu0 %v3284_v34  ;;  %v2896_v34 = vld [vmem:[%s4049_s5 + $0x34] ss:$24 sps:$4 sm:$0xff]  }
 0x2c4   :  { %1519 = vmatprep.subr.bf16.mxu0 %v2893_v31  ;;  %772 = vmatprep.subr.bf16.mxu1 %v2896_v34 }
 0x2c6   :  { %773 = vmatpush1.bf16.msra.mxu1 %v2894_v62 }
 0x2c7   :  { %774 = vmatprep.subr.bf16.mxu1 %v2899_v63 }
 0x2ca   :  { %775 = vmatpush1.bf16.msra.mxu1 %v2897_v0 }
 0x2cb   :  { %776 = vmatprep.subr.bf16.mxu1 %v2902_v3 }
 0x2ce   :  { %777 = vmatpush1.bf16.msra.mxu1 %v2900_v5 }
 0x2cf   :  { %778 = vmatprep.subr.bf16.mxu1 %v2905_v7 }
 0x2d2   :  { %779 = vmatpush1.bf16.msra.mxu1 %v2903_v9 }
 0x2d3   :  { %780 = vmatprep.subr.bf16.mxu1 %v2908_v11 }
 0x2d6   :  { %781 = vmatpush1.bf16.msra.mxu1 %v2906_v13 }
 0x2d7   :  { %782 = vmatprep.subr.bf16.mxu1 %v2911_v15 }
 0x2da   :  { %783 = vmatpush1.bf16.msra.mxu1 %v2909_v17 }
 0x2db   :  { %784 = vmatprep.subr.bf16.mxu1 %v2914_v21 }
 0x2de   :  { %785 = vmatpush1.bf16.msra.mxu1 %v2912_v23 }
 0x2df   :  { %852 = vmatprep.subr.bf16.mxu1 %v2917_v25 }
 0x2e1   :  { %803 = vmatmul.mubr.bf16.vlgmr.msra.gmra.mrb[4].mxu1 %v3457_v61 }
 0x2e2   :  { %853 = vmatpush1.bf16.msra.mxu1 %v3543_v27  ;;  %884 = vmatprep.mubr.bf16.mxu1 %v3084_v1 }
 0x2e3   :  { %854 = vmatprep.subr.bf16.mxu1 %v3548_v30 }
 0x317   :  { %v3350_v33 = vpop.xlane.xlu1 %454 }
 0x318   :  { %vm456_vm3 = vcmp.ge.f32.partialorder %v3347_v28, %v3350_v33 }
 0x319   :  { %v457_v35 = vsel %vm456_vm3, %v3275_v32, 128 }
 0x31a   :  { %v459_v38 = vshra.s32 %v457_v35, 16  ;;  %v458_v2 = vand.u32 65535, %v457_v35  ;;  %v3555_v35 = vld [vmem:[%s4049_s5 + $0x40] ss:$24 sps:$4 sm:$0xff]  }
 0x31b   :  { %855 = vmatpush1.bf16.msra.mxu1 %v3555_v35 }
 0x31c   :  { %v461_v41 = vcvt.s32.f32 %v459_v38  ;;  %v460_v6 = vcvt.s32.f32 %v458_v2  ;;  %v3562_v38 = vld [vmem:[%s4049_s5 + $0x74] ss:$24 sps:$4 sm:$0xff]   ;;  %v3574_v2 = vld [vmem:[%s4049_s5 + $0xa4] ss:$24 sps:$4 sm:$0xff]  }
 0x31d   :  { %856 = vmatprep.subr.bf16.mxu1 %v3562_v38 }
 0x31e   :  { %462 = vmin.xlane.f32.xlu1 %v461_v41 }
 0x379   :  { %v3478_v10 = vpop.f32.mrb[8].mxu0 }
 0x37a   :  { %v3480_v12 = vpop.f32.mrb[9].mxu0 }
 0x37b   :  { %v849_v14 = vpop.f32.mrb[10].mxu0 }
 0x37c   :  { %v850_v16 = vpop.f32.mrb[11].mxu0  ;;  %v3598_v14 = vld [vmem:[%s4049_s5 + $0x104] ss:$24 sps:$4 sm:$0xff]  }
 0x37d   :  { %v3604_v16 = vld [vmem:[%s4049_s5 + $0x100] ss:$24 sps:$4 sm:$0xff]  }
 0x3ab   :  { %v463_v4 = vpop.xlane.xlu1 %462 }
 0x3ac   :  { %vm464_vm4 = vcmp.eq.f32.partialorder %v461_v41, %v463_v4  ;;  %v469_v18 = vcvt.f32.s32 %v463_v4  ;;  %v3568_v41 = vld [vmem:[%s4049_s5 + $0x70] ss:$24 sps:$4 sm:$0xff]   ;;  %v3580_v4 = vld [vmem:[%s4049_s5 + $0xa0] ss:$24 sps:$4 sm:$0xff]  }
 0x3ad   :  { %v465_v8 = vsel %vm464_vm4, %v460_v6, inf  ;;  %857 = vmatpush1.bf16.msra.mxu1 %v3568_v41  ;;  %v3586_v6 = vld [vmem:[%s4049_s5 + $0xd4] ss:$24 sps:$4 sm:$0xff]  }
 0x3ae   :  { %466 = vmin.xlane.f32.xlu0 %v465_v8  ;;  %v470_v22 = vshll.u32 %v469_v18, 16  ;;  %858 = vmatprep.subr.bf16.mxu1 %v3574_v2  ;;  %v3592_v8 = vld [vmem:[%s4049_s5 + $0xd0] ss:$24 sps:$4 sm:$0xff]   ;;  %v3610_v18 = vld [vmem:[%s4049_s5 + $0x134] ss:$24 sps:$4 sm:$0xff]  }
 0x3b1   :  { %859 = vmatpush1.bf16.msra.mxu1 %v3580_v4 }
 0x3b2   :  { %860 = vmatprep.subr.bf16.mxu1 %v3586_v6 }
 0x3b5   :  { %861 = vmatpush1.bf16.msra.mxu1 %v3592_v8 }
 0x3b6   :  { %862 = vmatprep.subr.bf16.mxu1 %v3598_v14 }
 0x3b9   :  { %863 = vmatpush1.bf16.msra.mxu1 %v3604_v16 }
 0x3ba   :  { %864 = vmatprep.subr.bf16.mxu1 %v3610_v18 }
 0x43b   :  { %v467_v20 = vpop.xlane.xlu0 %466 }
 0x43c   :  { %v468_v24 = vcvt.f32.s32 %v467_v20  ;;  %v3616_v20 = vld [vmem:[%s4049_s5 + $0x130] ss:$24 sps:$4 sm:$0xff]  }
 0x43d   :  { %865 = vmatpush1.bf16.msra.mxu1 %v3616_v20 }
 0x43e   :  { %v471_v26 = vadd.s32 %v470_v22, %v468_v24  ;;  %v474_v22 = vsub.f32 %v3347_v28, %v3350_v33  ;;  %v3634_v28 = vld [vmem:[%s4049_s5 + $0x160] ss:$24 sps:$4 sm:$0xff]  }
 0x43f   :  { %v2939_v33 = vld [vmem:[%s4047_s3] sm:$0xff]  }
 0x440   :  { %473 = vst.msk [vmem:[%s4051_s7] sm:$0xff] %vm472_vm5, %v471_v26  ;;  %vm935_vm6 = vcmp.eq.s32.totalorder %v3275_v32, %v471_v26  ;;  %v475_v24 = vmul.f32 1.442695, %v474_v22 }
 0x441   :  { %vm2557_vm7 = vmpackc.low %vm935_vm6, %vm935_vm6 }
 0x442   :  { %2558 = vmatmul.mubr.msk.bf16.vlgmr.msra.gmra.mrb[12].mxu0 %vm2557_vm7, %v3085_v36  ;;  %3057 = vpow2.f32 %v475_v24 }
 0x443   :  { %1551 = vmatprep.mubr.bf16.mxu0 %v3084_v1  ;;  %1520 = vmatpush1.bf16.msra.mxu0 %v2891_v29 }
 0x444   :  { %1521 = vmatprep.subr.bf16.mxu0 %v2896_v34 }
 0x447   :  { %1522 = vmatpush1.bf16.msra.mxu0 %v2894_v62 }
 0x448   :  { %1523 = vmatprep.subr.bf16.mxu0 %v2899_v63 }
 0x44b   :  { %1524 = vmatpush1.bf16.msra.mxu0 %v2897_v0 }
 0x44c   :  { %1525 = vmatprep.subr.bf16.mxu0 %v2902_v3  ;;  %v3058_v0 = vpop.eup %3057  ;;  %v3629_v3 = vld [vmem:[%s4049_s5 + $0x164] ss:$24 sps:$4 sm:$0xff]  }
 0x44d   :  { %866 = vmatprep.subr.bf16.mxu1 %v3629_v3 }
 0x44e   :  { %867 = vmatpush1.bf16.msra.mxu1 %v3634_v28 }
 0x44f   :  { %1526 = vmatpush1.bf16.msra.mxu0 %v2900_v5  ;;  %2739 = vmatprep.subr.bf16.mxu1 %v3086_v48  ;;  %v2940_v5 = vld [vmem:[%s4047_s3 + $0x8] sm:$0xff]  }
 0x450   :  { %1527 = vmatprep.subr.bf16.mxu0 %v2905_v7  ;;  %v3088_v7 = vmov 6  }
 0x451   :  { %885 = vmatmul.mubr.bf16.vlgmr.msra.gmra.mrb[8].mxu1 %v3457_v61  ;;  %v2941_v61 = vld [vmem:[%s4047_s3 + $0x10] sm:$0xff]   ;;  %2789 = vset.pattern.permute.xlu0 %v3088_v7 }
 0x452   :  { %2755 = vmatprep.mubr.msk.bf16.mxu1 %vm3087_vm2, %v3086_v48  ;;  %2740 = vmatpush3.bf16.msra.mxu1 %v2939_v33 }
 0x453   :  { %1528 = vmatpush1.bf16.msra.mxu0 %v2903_v9  ;;  %2741 = vmatprep.subr.bf16.mxu1 %v3086_v48  ;;  %v2942_v9 = vld [vmem:[%s4047_s3 + $0x18] sm:$0xff]  }
 0x454   :  { %1529 = vmatprep.subr.bf16.mxu0 %v2908_v11  ;;  %v2943_v11 = vld [vmem:[%s4047_s3 + $0x20] sm:$0xff]  }
 0x456   :  { %2742 = vmatpush3.bf16.msra.mxu1 %v2940_v5 }
 0x457   :  { %1530 = vmatpush1.bf16.msra.mxu0 %v2906_v13  ;;  %2743 = vmatprep.subr.bf16.mxu1 %v3086_v48  ;;  %v2944_v13 = vld [vmem:[%s4047_s3 + $0x28] sm:$0xff]  }
 0x458   :  { %1531 = vmatprep.subr.bf16.mxu0 %v2911_v15  ;;  %v2945_v15 = vld [vmem:[%s4047_s3 + $0x30] sm:$0xff]  }
 0x45a   :  { %2744 = vmatpush3.bf16.msra.mxu1 %v2941_v61  ;;  %v3678_v61 = vpop.f32.mrb[4].mxu1 }
 0x45b   :  { %1532 = vmatpush1.bf16.msra.mxu0 %v2909_v17  ;;  %2745 = vmatprep.subr.bf16.mxu1 %v3086_v48  ;;  %v2946_v17 = vld [vmem:[%s4047_s3 + $0x38] sm:$0xff]  }
 0x45c   :  { %1533 = vmatprep.subr.bf16.mxu0 %v2914_v21 }
 0x45e   :  { %2746 = vmatpush3.bf16.msra.mxu1 %v2942_v9  ;;  %v3680_v9 = vpop.f32.mrb[5].mxu1 }
 0x45f   :  { %1534 = vmatpush1.bf16.msra.mxu0 %v2912_v23  ;;  %2747 = vmatprep.subr.bf16.mxu1 %v3086_v48 }
 0x460   :  { %1601 = vmatprep.subr.bf16.mxu0 %v2917_v25 }
 0x462   :  { %2748 = vmatpush3.bf16.msra.mxu1 %v2943_v11  ;;  %v808_v11 = vpop.f32.mrb[6].mxu1 }
 0x463   :  { %2749 = vmatprep.subr.bf16.mxu1 %v3086_v48 }
 0x466   :  { %2750 = vmatpush3.bf16.msra.mxu1 %v2944_v13  ;;  %v809_v13 = vpop.f32.mrb[7].mxu1 }
 0x467   :  { %2751 = vmatprep.subr.bf16.mxu1 %v3086_v48 }
 0x46a   :  { %2752 = vmatpush3.bf16.msra.mxu1 %v2945_v15 }
 0x46b   :  { %2753 = vmatprep.subr.bf16.mxu1 %v3086_v48 }
 0x46e   :  { %2754 = vmatpush3.bf16.msra.mxu1 %v2946_v17 }
 0x46f   :  { %1560 = vmatprep.subr.bf16.mxu1 %v3363_v43 }
 0x515   :  { %v1069_v26 = vpop.f32.mrb[12].mxu0 }
 0x516   :  { %v3622_v29 = vpop.f32.mrb[13].mxu0  ;;  %v1079_v31 = vmul.f32 %v1069_v26, %v3299_v42  ;;  %v1076_v34 = vmul.f32 %v1069_v26, %v3294_v37 }
 0x517   :  { %v1073_v62 = vpop.f32.mrb[14].mxu0 }
 0x518   :  { %1080 = vadd.xlane.f32.xlu0 %v1079_v31  ;;  %1077 = vadd.xlane.f32.xlu1 %v1076_v34  ;;  %v1074_v63 = vpop.f32.mrb[15].mxu0 }
 0x51c   :  { %477 = vadd.xlane.f32.xlu0 %v3058_v0 }
 0x5a5   :  { %v1081_v21 = vpop.xlane.xlu0 %1080  ;;  %v1078_v23 = vpop.xlane.xlu1 %1077 }
 0x5a6   :  { %v1082_v25 = vmax.f32 %v1078_v23, %v1081_v21 }
 0x5a8   :  { %v1083_v22 = vsub.f32 %v1078_v23, %v1082_v25  ;;  %v1086_v24 = vsub.f32 %v1081_v21, %v1082_v25 }
 0x5a9   :  { %v478_v26 = vpop.xlane.xlu0 %477 }
 0x5aa   :  { %v1084_v31 = vmul.f32 1.442695, %v1083_v22  ;;  %v1087_v34 = vmul.f32 1.442695, %v1086_v24  ;;  %3059 = vrcp.f32 %v478_v26  ;;  %v3092_v24 = vmov 4  }
 0x5ab   :  { %v3093_v26 = vmov 5  }
 0x5ac   :  { %3061 = vpow2.f32 %v1084_v31  ;;  %v2949_v31 = vld [vmem:[%s4045_s2 + $0x4] ss:$8 sps:$4 sm:$0xff]  }
 0x5ad   :  { %3063 = vpow2.f32 %v1087_v34 }
 0x5b4   :  { %v3060_v62 = vpop.eup %3059 }
 0x5b5   :  { %v3675_v63 = vmul.f32 %v3060_v62, %v3058_v0 }
 0x5b6   :  { %v3062_v33 = vpop.eup %3061 }
 0x5b7   :  { %v3064_v5 = vpop.eup %3063  ;;  %895 = vperm.xlu0 %2789, %v3675_v63  }
 0x5b8   :  { %v1089_v43 = vadd.f32 %v3064_v5, %v3062_v33 }
 0x5ba   :  { %3065 = vrcp.f32 %v1089_v43 }
 0x5bb   :  { %2797 = vset.pattern.permute.xlu0 %v3084_v1 }
 0x5c4   :  { %v3066_v15 = vpop.eup %3065 }
 0x5c5   :  { %v1092_v17 = vmul.f32 %v3066_v15, %v3062_v33  ;;  %v1094_v21 = vmul.f32 %v3066_v15, %v3064_v5 }
 0x5c7   :  { %v1093_v0 = vmul.f32 %v1092_v17, %v3296_v39  ;;  %v1095_v23 = vmul.f32 %v1094_v21, %v3301_v45 }
 0x5c9   :  { %v1096_v25 = vadd.f32 %v1095_v23, %v1093_v0 }
 0x5cb   :  { %v1097_v22 = vpack.c.bf16 %v1096_v25, %v1096_v25 }
 0x5cd   :  { %2756 = vmatmul.mubr.bf16.vlgmr.msra.gmra.mrb[12].mxu1 %v1097_v22 }
 0x5ce   :  { %1561 = vmatpush1.bf16.msra.mxu1 %v3358_v40  ;;  %1592 = vmatprep.mubr.bf16.mxu1 %v3084_v1  ;;  %v886_v40 = vpop.f32.mrb[8].mxu1 }
 0x5cf   :  { %1562 = vmatprep.subr.bf16.mxu1 %v3368_v44  ;;  %v888_v44 = vpop.f32.mrb[9].mxu1 }
 0x5d2   :  { %1563 = vmatpush1.bf16.msra.mxu1 %v3375_v46  ;;  %v890_v46 = vpop.f32.mrb[10].mxu1 }
 0x5d3   :  { %1564 = vmatprep.subr.bf16.mxu1 %v3381_v47  ;;  %v891_v47 = vpop.f32.mrb[11].mxu1 }
 0x5d6   :  { %1565 = vmatpush1.bf16.msra.mxu1 %v3387_v49 }
 0x5d7   :  { %1566 = vmatprep.subr.bf16.mxu1 %v3393_v50 }
 0x5da   :  { %1567 = vmatpush1.bf16.msra.mxu1 %v3398_v51 }
 0x5db   :  { %1568 = vmatprep.subr.bf16.mxu1 %v3403_v52 }
 0x5de   :  { %1569 = vmatpush1.bf16.msra.mxu1 %v3410_v53 }
 0x5df   :  { %1570 = vmatprep.subr.bf16.mxu1 %v3415_v54 }
 0x5e2   :  { %1571 = vmatpush1.bf16.msra.mxu1 %v3422_v55  ;;  %v3089_v55 = vmov 1  }
 0x5e3   :  { %1572 = vmatprep.subr.bf16.mxu1 %v3427_v56 }
 0x5e6   :  { %1573 = vmatpush1.bf16.msra.mxu1 %v3434_v57 }
 0x5e7   :  { %1574 = vmatprep.subr.bf16.mxu1 %v3439_v58 }
 0x5ea   :  { %1575 = vmatpush1.bf16.msra.mxu1 %v3446_v59 }
 0x5eb   :  { %1784 = vmatprep.subr.bf16.mxu1 %v2949_v31 }
 0x636   :  { %v896_v33 = vpop.permute.xlu0 %895 }
 0x6a0   :  { %v1196_v49 = vpop.f32.mrb[12].mxu1 }
 0x6a1   :  { %v1197_v50 = vadd.f32 %v1196_v49, %v3622_v29  ;;  %v2757_v51 = vpop.f32.mrb[13].mxu1  ;;  %v3091_v29 = vmov 3  }
 0x6a2   :  { %v1199_v52 = vpop.f32.mrb[14].mxu1 }
 0x6a3   :  { %v3703_v53 = vadd.f32 %v3344_v19, %v1197_v50  ;;  %v2758_v54 = vpop.f32.mrb[15].mxu1  ;;  %v3090_v19 = vmov 2  }
 0x6a5   :  { %1203 = vmax.xlane.f32.xlu1 %v3703_v53 }
 0x6b6   :  { %900 = vperm.xlu1 %2790, %v3675_v63  }
 0x6ba   :  { %2791 = vset.pattern.permute.xlu1 %v3089_v55 }
 0x732   :  { %v3708_v56 = vpop.xlane.xlu1 %1203 }
 0x733   :  { %vm1205_vm8 = vcmp.ge.f32.partialorder %v3703_v53, %v3708_v56 }
 0x734   :  { %v1206_v57 = vsel %vm1205_vm8, %v3275_v32, 128 }
 0x735   :  { %v1208_v58 = vshra.s32 %v1206_v57, 16  ;;  %v1207_v62 = vand.u32 65535, %v1206_v57 }
 0x736   :  { %v901_v34 = vpop.permute.xlu1 %900 }
 0x737   :  { %v1210_v59 = vcvt.s32.f32 %v1208_v58  ;;  %v1209_v43 = vcvt.s32.f32 %v1207_v62  ;;  %v903_v11 = vmul.f32 %v901_v34, %v3678_v61 }
 0x739   :  { %1211 = vmin.xlane.f32.xlu1 %v1210_v59 }
 0x74a   :  { %906 = vperm.xlu1 %2791, %v3675_v63  }
 0x74e   :  { %2792 = vset.pattern.permute.xlu1 %v3090_v19 }
 0x74f   :  { %912 = vperm.xlu1 %2792, %v3675_v63  }
 0x753   :  { %2793 = vset.pattern.permute.xlu1 %v3091_v29 }
 0x754   :  { %918 = vperm.xlu1 %2793, %v3675_v63  }
 0x758   :  { %2794 = vset.pattern.permute.xlu1 %v3092_v24 }
 0x759   :  { %924 = vperm.xlu1 %2794, %v3675_v63  }
 0x75d   :  { %2795 = vset.pattern.permute.xlu1 %v3093_v26 }
 0x75e   :  { %930 = vperm.xlu1 %2795, %v3675_v63   ;;  %v898_v63 = vmul.f32 %v896_v33, %v3451_v60 }
 0x760   :  { %v904_v17 = vadd.f32 %v903_v11, %v898_v63 }
 0x762   :  { %2796 = vset.pattern.permute.xlu1 %v3088_v7 }
 0x7c6   :  { %v3726_v5 = vpop.xlane.xlu1 %1211 }
 0x7c7   :  { %vm1213_vm9 = vcmp.eq.f32.partialorder %v1210_v59, %v3726_v5 }
 0x7c8   :  { %v1214_v13 = vsel %vm1213_vm9, %v1209_v43, inf }
 0x7c9   :  { %1215 = vmin.xlane.f32.xlu1 %v1214_v13 }
 0x7ca   :  { %v907_v15 = vpop.permute.xlu1 %906 }
 0x7cb   :  { %v909_v21 = vmul.f32 %v907_v15, %v3680_v9  ;;  %v2947_v9 = vld [vmem:[%s4045_s2] ss:$8 sps:$4 sm:$0xff]   ;;  %v1223_v15 = vsub.f32 %v3703_v53, %v3708_v56 }
 0x7cc   :  { %v2972_v53 = vld [vmem:[%s4047_s3 + $0x8] sm:$0xff]   ;;  %v2975_v56 = vld [vmem:[%s4047_s3 + $0x20] sm:$0xff]  }
 0x7cd   :  { %v910_v0 = vadd.f32 %v909_v21, %v904_v17  ;;  %v1224_v17 = vmul.f32 1.442695, %v1223_v15  ;;  %v3011_v15 = vld [vmem:[%s4049_s5 + $0xf4] ss:$24 sps:$4 sm:$0xff]  }
 0x7ce   :  { %v913_v23 = vpop.permute.xlu1 %912 }
 0x7cf   :  { %v915_v25 = vmul.f32 %v913_v23, %v3478_v10  ;;  %v2952_v10 = vld [vmem:[%s4045_s2 + $0x14] ss:$8 sps:$4 sm:$0xff]   ;;  %3067 = vpow2.f32 %v1224_v17 }
 0x7d1   :  { %v916_v22 = vadd.f32 %v915_v25, %v910_v0 }
 0x7d3   :  { %v919_v46 = vpop.permute.xlu1 %918 }
 0x7d4   :  { %v921_v47 = vmul.f32 %v919_v46, %v3480_v12  ;;  %v2950_v12 = vld [vmem:[%s4045_s2 + $0x10] ss:$8 sps:$4 sm:$0xff]  }
 0x7d6   :  { %v922_v49 = vadd.f32 %v921_v47, %v916_v22 }
 0x7d8   :  { %v925_v61 = vpop.permute.xlu1 %924 }
 0x7d9   :  { %v927_v50 = vmul.f32 %v925_v61, %v886_v40  ;;  %v2955_v40 = vld [vmem:[%s4045_s2 + $0x24] ss:$8 sps:$4 sm:$0xff]   ;;  %v3068_v47 = vpop.eup %3067 }
 0x7da   :  { %v2976_v61 = vld [vmem:[%s4047_s3 + $0x28] sm:$0xff]  }
 0x7db   :  { %v928_v51 = vadd.f32 %v927_v50, %v922_v49  ;;  %v2971_v49 = vld [vmem:[%s4047_s3] sm:$0xff]   ;;  %v2977_v50 = vld [vmem:[%s4047_s3 + $0x30] sm:$0xff]  }
 0x7dd   :  { %v931_v52 = vpop.permute.xlu1 %930 }
 0x7de   :  { %v933_v54 = vmul.f32 %v931_v52, %v888_v44  ;;  %v2979_v52 = vld [vmem:[%s4049_s5] ss:$24 sps:$4 sm:$0xff]  }
 0x7e0   :  { %v3734_v60 = vadd.f32 %v933_v54, %v928_v51  ;;  %v2978_v51 = vld [vmem:[%s4047_s3 + $0x38] sm:$0xff]  }
 0x7e1   :  { %v2981_v54 = vld [vmem:[%s4049_s5 + $0x4] ss:$24 sps:$4 sm:$0xff]  }
 0x7e2   :  { %v1230_v57 = vpack.c.bf16 %v3734_v60, %v3734_v60 }
 0x7e4   :  { %1552 = vmatmul.mubr.bf16.vlgmr.msra.gmra.mrb[16].mxu0 %v1230_v57  ;;  %1593 = vmatmul.mubr.bf16.vlgmr.msra.gmra.mrb[16].mxu1 %v1230_v57 }
 0x7e5   :  { %1602 = vmatpush1.bf16.msra.mxu0 %v3543_v27  ;;  %1633 = vmatprep.mubr.bf16.mxu0 %v3084_v1  ;;  %v2953_v27 = vld [vmem:[%s4045_s2 + $0x20] ss:$8 sps:$4 sm:$0xff]  }
 0x7e6   :  { %1603 = vmatprep.subr.bf16.mxu0 %v3548_v30  ;;  %1785 = vmatpush1.bf16.msra.mxu1 %v2947_v9  ;;  %v2958_v30 = vld [vmem:[%s4045_s2 + $0x34] ss:$8 sps:$4 sm:$0xff]  }
 0x7e7   :  { %1786 = vmatprep.subr.bf16.mxu1 %v2952_v10  ;;  %1816 = vmatprep.mubr.bf16.mxu1 %v3084_v1 }
 0x7e9   :  { %1604 = vmatpush1.bf16.msra.mxu0 %v3555_v35  ;;  %v2956_v35 = vld [vmem:[%s4045_s2 + $0x30] ss:$8 sps:$4 sm:$0xff]  }
 0x7ea   :  { %1605 = vmatprep.subr.bf16.mxu0 %v3562_v38  ;;  %1787 = vmatpush1.bf16.msra.mxu1 %v2950_v12  ;;  %v2961_v38 = vld [vmem:[%s4045_s2 + $0x44] ss:$8 sps:$4 sm:$0xff]  }
 0x7eb   :  { %1788 = vmatprep.subr.bf16.mxu1 %v2955_v40 }
 0x7ed   :  { %1606 = vmatpush1.bf16.msra.mxu0 %v3568_v41  ;;  %v2959_v41 = vld [vmem:[%s4045_s2 + $0x40] ss:$8 sps:$4 sm:$0xff]  }
 0x7ee   :  { %1607 = vmatprep.subr.bf16.mxu0 %v3574_v2  ;;  %1789 = vmatpush1.bf16.msra.mxu1 %v2953_v27  ;;  %v2964_v2 = vld [vmem:[%s4045_s2 + $0x54] ss:$8 sps:$4 sm:$0xff]  }
 0x7ef   :  { %1790 = vmatprep.subr.bf16.mxu1 %v2958_v30 }
 0x7f1   :  { %1608 = vmatpush1.bf16.msra.mxu0 %v3580_v4  ;;  %v2962_v4 = vld [vmem:[%s4045_s2 + $0x50] ss:$8 sps:$4 sm:$0xff]  }
 0x7f2   :  { %1609 = vmatprep.subr.bf16.mxu0 %v3586_v6  ;;  %1791 = vmatpush1.bf16.msra.mxu1 %v2956_v35  ;;  %v2967_v6 = vld [vmem:[%s4045_s2 + $0x64] ss:$8 sps:$4 sm:$0xff]  }
 0x7f3   :  { %1792 = vmatprep.subr.bf16.mxu1 %v2961_v38 }
 0x7f5   :  { %1610 = vmatpush1.bf16.msra.mxu0 %v3592_v8  ;;  %v2965_v8 = vld [vmem:[%s4045_s2 + $0x60] ss:$8 sps:$4 sm:$0xff]  }
 0x7f6   :  { %1611 = vmatprep.subr.bf16.mxu0 %v3598_v14  ;;  %1793 = vmatpush1.bf16.msra.mxu1 %v2959_v41  ;;  %v2970_v14 = vld [vmem:[%s4045_s2 + $0x74] ss:$8 sps:$4 sm:$0xff]  }
 0x7f7   :  { %1794 = vmatprep.subr.bf16.mxu1 %v2964_v2 }
 0x7f9   :  { %1612 = vmatpush1.bf16.msra.mxu0 %v3604_v16  ;;  %v2968_v16 = vld [vmem:[%s4045_s2 + $0x70] ss:$8 sps:$4 sm:$0xff]  }
 0x7fa   :  { %1613 = vmatprep.subr.bf16.mxu0 %v3610_v18  ;;  %1795 = vmatpush1.bf16.msra.mxu1 %v2962_v4  ;;  %v1218_v18 = vcvt.f32.s32 %v3726_v5 }
 0x7fb   :  { %1796 = vmatprep.subr.bf16.mxu1 %v2967_v6 }
 0x7fc   :  { %v1219_v44 = vshll.u32 %v1218_v18, 16  ;;  %v2991_v18 = vld [vmem:[%s4049_s5 + $0x60] ss:$24 sps:$4 sm:$0xff]  }
 0x7fd   :  { %1614 = vmatpush1.bf16.msra.mxu0 %v3616_v20 }
 0x7fe   :  { %1615 = vmatprep.subr.bf16.mxu0 %v3629_v3  ;;  %1797 = vmatpush1.bf16.msra.mxu1 %v2965_v8  ;;  %v2987_v8 = vld [vmem:[%s4049_s5 + $0x34] ss:$24 sps:$4 sm:$0xff]  }
 0x7ff   :  { %1798 = vmatprep.subr.bf16.mxu1 %v2970_v14  ;;  %v2985_v14 = vld [vmem:[%s4049_s5 + $0x30] ss:$24 sps:$4 sm:$0xff]  }
 0x801   :  { %1616 = vmatpush1.bf16.msra.mxu0 %v3634_v28 }
 0x802   :  { %1799 = vmatpush1.bf16.msra.mxu1 %v2968_v16  ;;  %2759 = vmatprep.subr.bf16.mxu0 %v3086_v48  ;;  %v2993_v16 = vld [vmem:[%s4049_s5 + $0x64] ss:$24 sps:$4 sm:$0xff]  }
 0x803   :  { %2268 = vmatprep.subr.bf16.mxu1 %v2981_v54  ;;  %v3018_v54 = vld [vmem:[%s4049_s5 + $0x128] ss:$24 sps:$4 sm:$0xff]  }
 0x804   :  { %1634 = vmatmul.mubr.bf16.vlgmr.msra.gmra.mrb[20].mxu0 %v1230_v57  ;;  %v2984_v57 = vld [vmem:[%s4049_s5 + $0xc] ss:$24 sps:$4 sm:$0xff]  }
 0x805   :  { %2775 = vmatprep.mubr.msk.bf16.mxu0 %vm3087_vm2, %v3086_v48  ;;  %2760 = vmatpush3.bf16.msra.mxu0 %v2971_v49  ;;  %v3021_v49 = vld [vmem:[%s4049_s5 + $0x150] ss:$24 sps:$4 sm:$0xff]  }
 0x806   :  { %2761 = vmatprep.subr.bf16.mxu0 %v3086_v48 }
 0x809   :  { %2762 = vmatpush3.bf16.msra.mxu0 %v2972_v53  ;;  %v2994_v53 = vld [vmem:[%s4049_s5 + $0x68] ss:$24 sps:$4 sm:$0xff]  }
 0x80a   :  { %2763 = vmatprep.subr.bf16.mxu0 %v3086_v48 }
 0x856   :  { %v1216_v20 = vpop.xlane.xlu1 %1215 }
 0x857   :  { %v1217_v3 = vcvt.f32.s32 %v1216_v20  ;;  %v2999_v20 = vld [vmem:[%s4049_s5 + $0x94] ss:$24 sps:$4 sm:$0xff]  }
 0x859   :  { %v1220_v58 = vadd.s32 %v1219_v44, %v1217_v3  ;;  %v2997_v44 = vld [vmem:[%s4049_s5 + $0x90] ss:$24 sps:$4 sm:$0xff]   ;;  %v3003_v3 = vld [vmem:[%s4049_s5 + $0xc0] ss:$24 sps:$4 sm:$0xff]  }
 0x85b   :  { %2567 = vst.msk [vmem:[%s4051_s7 + $0x8] sm:$0xff] %vm472_vm5, %v1220_v58  ;;  %vm1684_vm10 = vcmp.eq.s32.totalorder %v3275_v32, %v1220_v58  ;;  %v3005_v58 = vld [vmem:[%s4049_s5 + $0xc4] ss:$24 sps:$4 sm:$0xff]  }
 0x85c   :  { %vm2633_vm11 = vmpackc.low %vm1684_vm10, %vm1684_vm10 }
 0x85d   :  { %2634 = vmatmul.mubr.msk.bf16.vlgmr.msra.gmra.mrb[20].mxu1 %vm2633_vm11, %v3085_v36 }
 0x85e   :  { %2300 = vmatprep.mubr.bf16.mxu1 %v3084_v1  ;;  %2269 = vmatpush1.bf16.msra.mxu1 %v2979_v52  ;;  %v3020_v52 = vld [vmem:[%s4049_s5 + $0x12c] ss:$24 sps:$4 sm:$0xff]  }
 0x85f   :  { %2270 = vmatprep.subr.bf16.mxu1 %v2987_v8 }
 0x862   :  { %2271 = vmatpush1.bf16.msra.mxu1 %v2985_v14 }
 0x863   :  { %2272 = vmatprep.subr.bf16.mxu1 %v2993_v16 }
 0x866   :  { %2273 = vmatpush1.bf16.msra.mxu1 %v2991_v18 }
 0x867   :  { %2274 = vmatprep.subr.bf16.mxu1 %v2999_v20 }
 0x86a   :  { %2275 = vmatpush1.bf16.msra.mxu1 %v2997_v44 }
 0x86b   :  { %2276 = vmatprep.subr.bf16.mxu1 %v3005_v58  ;;  %v3038_v58 = vld [vmem:[%s4049_s5 + $0xa4] ss:$24 sps:$4 sm:$0xff]  }
 0x86e   :  { %2277 = vmatpush1.bf16.msra.mxu1 %v3003_v3  ;;  %v3033_v3 = vld [vmem:[%s4049_s5 + $0x70] ss:$24 sps:$4 sm:$0xff]  }
 0x86f   :  { %2278 = vmatprep.subr.bf16.mxu1 %v3011_v15  ;;  %v3050_v15 = vld [vmem:[%s4049_s5 + $0x164] ss:$24 sps:$4 sm:$0xff]  }
 0x8b7   :  { %v3811_v28 = vpop.f32.mrb[16].mxu0  ;;  %v3813_v59 = vpop.f32.mrb[16].mxu1 }
 0x8b8   :  { %v3815_v31 = vpop.f32.mrb[17].mxu0  ;;  %v3817_v34 = vpop.f32.mrb[17].mxu1 }
 0x8b9   :  { %v1557_v62 = vpop.f32.mrb[18].mxu0  ;;  %v1598_v33 = vpop.f32.mrb[18].mxu1 }
 0x8ba   :  { %v1558_v5 = vpop.f32.mrb[19].mxu0  ;;  %v1599_v43 = vpop.f32.mrb[19].mxu1 }
 0x8d7   :  { %v3819_v11 = vpop.f32.mrb[20].mxu0 }
 0x8d8   :  { %v3821_v13 = vpop.f32.mrb[21].mxu0 }
 0x8d9   :  { %v1639_v63 = vpop.f32.mrb[22].mxu0 }
 0x8da   :  { %v1640_v36 = vpop.f32.mrb[23].mxu0 }
 0x8db   :  { %v3009_v36 = vld [vmem:[%s4049_s5 + $0xf0] ss:$24 sps:$4 sm:$0xff]  }
 0x8dc   :  { %2279 = vmatpush1.bf16.msra.mxu1 %v3009_v36  ;;  %v3045_v36 = vld [vmem:[%s4049_s5 + $0x130] ss:$24 sps:$4 sm:$0xff]  }
 0x930   :  { %v1818_v21 = vpop.f32.mrb[20].mxu1 }
 0x931   :  { %v3825_v0 = vpop.f32.mrb[21].mxu1  ;;  %v1828_v23 = vmul.f32 %v1818_v21, %v3299_v42  ;;  %v1825_v25 = vmul.f32 %v1818_v21, %v3294_v37  ;;  %v2973_v37 = vld [vmem:[%s4047_s3 + $0x10] sm:$0xff]   ;;  %v2974_v42 = vld [vmem:[%s4047_s3 + $0x18] sm:$0xff]   ;;  %v2982_v21 = vld [vmem:[%s4049_s5 + $0x8] ss:$24 sps:$4 sm:$0xff]  }
 0x932   :  { %v1822_v22 = vpop.f32.mrb[22].mxu1  ;;  %2764 = vmatpush3.bf16.msra.mxu0 %v2973_v37  ;;  %v3002_v37 = vld [vmem:[%s4049_s5 + $0x9c] ss:$24 sps:$4 sm:$0xff]  }
 0x933   :  { %1829 = vadd.xlane.f32.xlu1 %v1828_v23  ;;  %1826 = vadd.xlane.f32.xlu0 %v1825_v25  ;;  %v1823_v46 = vpop.f32.mrb[23].mxu1  ;;  %v3017_v23 = vld [vmem:[%s4049_s5 + $0x124] ss:$24 sps:$4 sm:$0xff]   ;;  %v3015_v25 = vld [vmem:[%s4049_s5 + $0x120] ss:$24 sps:$4 sm:$0xff]  }
 0x934   :  { %2765 = vmatprep.subr.bf16.mxu0 %v3086_v48  ;;  %v2988_v22 = vld [vmem:[%s4049_s5 + $0x38] ss:$24 sps:$4 sm:$0xff]   ;;  %2280 = vmatprep.subr.bf16.mxu1 %v3017_v23  ;;  %v2996_v46 = vld [vmem:[%s4049_s5 + $0x6c] ss:$24 sps:$4 sm:$0xff]  }
 0x935   :  { %2281 = vmatpush1.bf16.msra.mxu1 %v3015_v25  ;;  %v3083_v25 = vld [vmem:[%s4048_s4] ss:$0 sm:$0xff] }
 0x936   :  { %2766 = vmatpush3.bf16.msra.mxu0 %v2974_v42  ;;  %v3029_v42 = vld [vmem:[%s4049_s5 + $0x14] ss:$24 sps:$4 sm:$0xff]  }
 0x937   :  { %1226 = vadd.xlane.f32.xlu0 %v3068_v47  ;;  %2767 = vmatprep.subr.bf16.mxu0 %v3086_v48 }
 0x93a   :  { %2768 = vmatpush3.bf16.msra.mxu0 %v2975_v56  ;;  %v3000_v56 = vld [vmem:[%s4049_s5 + $0x98] ss:$24 sps:$4 sm:$0xff]  }
 0x93b   :  { %2769 = vmatprep.subr.bf16.mxu0 %v3086_v48 }
 0x93e   :  { %2770 = vmatpush3.bf16.msra.mxu0 %v2976_v61  ;;  %v3008_v61 = vld [vmem:[%s4049_s5 + $0xcc] ss:$24 sps:$4 sm:$0xff]  }
 0x93f   :  { %2771 = vmatprep.subr.bf16.mxu0 %v3086_v48 }
 0x942   :  { %2772 = vmatpush3.bf16.msra.mxu0 %v2977_v50  ;;  %v3006_v50 = vld [vmem:[%s4049_s5 + $0xc8] ss:$24 sps:$4 sm:$0xff]  }
 0x943   :  { %2773 = vmatprep.subr.bf16.mxu0 %v3086_v48 }
 0x946   :  { %2774 = vmatpush3.bf16.msra.mxu0 %v2978_v51  ;;  %v3012_v51 = vld [vmem:[%s4049_s5 + $0xf8] ss:$24 sps:$4 sm:$0xff]  }
 0x947   :  { %2309 = vmatprep.subr.bf16.mxu0 %v2984_v57  ;;  %v3026_v57 = vld [vmem:[%s4049_s5 + $0x15c] ss:$24 sps:$4 sm:$0xff]  }
 0x9c0   :  { %v1830_v9 = vpop.xlane.xlu1 %1829  ;;  %v1827_v10 = vpop.xlane.xlu0 %1826 }
 0x9c1   :  { %v1831_v12 = vmax.f32 %v1827_v10, %v1830_v9 }
 0x9c3   :  { %v1832_v48 = vsub.f32 %v1827_v10, %v1831_v12  ;;  %v1835_v40 = vsub.f32 %v1830_v9, %v1831_v12  ;;  %v3024_v9 = vld [vmem:[%s4049_s5 + $0x158] ss:$24 sps:$4 sm:$0xff]  }
 0x9c4   :  { %v1227_v27 = vpop.xlane.xlu0 %1226 }
 0x9c5   :  { %v1833_v30 = vmul.f32 1.442695, %v1832_v48  ;;  %v1836_v35 = vmul.f32 1.442695, %v1835_v40  ;;  %3069 = vrcp.f32 %v1227_v27 }
 0x9c7   :  { %3071 = vpow2.f32 %v1833_v30 }
 0x9c8   :  { %3073 = vpow2.f32 %v1836_v35 }
 0x9cf   :  { %v3070_v38 = vpop.eup %3069 }
 0x9d0   :  { %v1229_v41 = vmul.f32 %v3070_v38, %v3068_v47  ;;  %v3023_v47 = vld [vmem:[%s4049_s5 + $0x154] ss:$24 sps:$4 sm:$0xff]  }
 0x9d1   :  { %v3072_v2 = vpop.eup %3071  ;;  %2282 = vmatprep.subr.bf16.mxu1 %v3023_v47 }
 0x9d2   :  { %v3074_v4 = vpop.eup %3073  ;;  %1649 = vperm.xlu0 %2797, %v1229_v41   ;;  %1644 = vperm.xlu1 %2796, %v1229_v41  }
 0x9d3   :  { %v1838_v6 = vadd.f32 %v3074_v4, %v3072_v2  ;;  %2283 = vmatpush1.bf16.msra.mxu1 %v3021_v49 }
 0x9d4   :  { %2350 = vmatprep.subr.bf16.mxu1 %v3029_v42 }
 0x9d5   :  { %3075 = vrcp.f32 %v1838_v6 }
 0x9d6   :  { %2798 = vset.pattern.permute.xlu1 %v3089_v55 }
 0x9d7   :  { %1655 = vperm.xlu1 %2798, %v1229_v41  }
 0x9db   :  { %2799 = vset.pattern.permute.xlu1 %v3090_v19 }
 0x9dc   :  { %1661 = vperm.xlu1 %2799, %v1229_v41  }
 0x9df   :  { %v3076_v62 = vpop.eup %3075 }
 0x9e0   :  { %2800 = vset.pattern.permute.xlu1 %v3091_v29  ;;  %v1841_v33 = vmul.f32 %v3076_v62, %v3072_v2  ;;  %v1843_v5 = vmul.f32 %v3076_v62, %v3074_v4  ;;  %v3041_v62 = vld [vmem:[%s4049_s5 + $0xd4] ss:$24 sps:$4 sm:$0xff]  }
 0x9e1   :  { %1667 = vperm.xlu1 %2800, %v1229_v41  }
 0x9e2   :  { %v1842_v43 = vmul.f32 %v1841_v33, %v3296_v39  ;;  %v1844_v63 = vmul.f32 %v1843_v5, %v3301_v45  ;;  %v2990_v45 = vld [vmem:[%s4049_s5 + $0x3c] ss:$24 sps:$4 sm:$0xff]   ;;  %v3039_v33 = vld [vmem:[%s4049_s5 + $0xd0] ss:$24 sps:$4 sm:$0xff]  }
 0x9e3   :  { %v3044_v5 = vld [vmem:[%s4049_s5 + $0x104] ss:$24 sps:$4 sm:$0xff]  }
 0x9e4   :  { %v1845_v17 = vadd.f32 %v1844_v63, %v1842_v43  ;;  %v3042_v43 = vld [vmem:[%s4049_s5 + $0x100] ss:$24 sps:$4 sm:$0xff]   ;;  %v3047_v63 = vld [vmem:[%s4049_s5 + $0x134] ss:$24 sps:$4 sm:$0xff]  }
 0x9e5   :  { %2801 = vset.pattern.permute.xlu1 %v3092_v24 }
 0x9e6   :  { %1673 = vperm.xlu1 %2801, %v1229_v41   ;;  %v1846_v39 = vpack.c.bf16 %v1845_v17, %v1845_v17  ;;  %v3048_v17 = vld [vmem:[%s4049_s5 + $0x160] ss:$24 sps:$4 sm:$0xff]  }
 0x9e8   :  { %2776 = vmatmul.mubr.bf16.vlgmr.msra.gmra.mrb[24].mxu0 %v1846_v39 }
 0x9e9   :  { %2310 = vmatpush1.bf16.msra.mxu0 %v2982_v21  ;;  %2341 = vmatprep.mubr.bf16.mxu0 %v3084_v1 }
 0x9ea   :  { %2802 = vset.pattern.permute.xlu1 %v3093_v26  ;;  %2311 = vmatprep.subr.bf16.mxu0 %v2990_v45 }
 0x9eb   :  { %1679 = vperm.xlu1 %2802, %v1229_v41  }
 0x9ed   :  { %2312 = vmatpush1.bf16.msra.mxu0 %v2988_v22 }
 0x9ee   :  { %2313 = vmatprep.subr.bf16.mxu0 %v2996_v46 }
 0x9ef   :  { %2803 = vset.pattern.permute.xlu1 %v3088_v7  ;;  %v3014_v7 = vld [vmem:[%s4049_s5 + $0xfc] ss:$24 sps:$4 sm:$0xff]  }
 0x9f1   :  { %2314 = vmatpush1.bf16.msra.mxu0 %v2994_v53 }
 0x9f2   :  { %2315 = vmatprep.subr.bf16.mxu0 %v3002_v37 }
 0x9f5   :  { %2316 = vmatpush1.bf16.msra.mxu0 %v3000_v56 }
 0x9f6   :  { %2317 = vmatprep.subr.bf16.mxu0 %v3008_v61 }
 0x9f9   :  { %2318 = vmatpush1.bf16.msra.mxu0 %v3006_v50 }
 0x9fa   :  { %2319 = vmatprep.subr.bf16.mxu0 %v3014_v7 }
 0x9fd   :  { %2320 = vmatpush1.bf16.msra.mxu0 %v3012_v51 }
 0x9fe   :  { %2321 = vmatprep.subr.bf16.mxu0 %v3020_v52 }
 0xa01   :  { %2322 = vmatpush1.bf16.msra.mxu0 %v3018_v54 }
 0xa02   :  { %2323 = vmatprep.subr.bf16.mxu0 %v3026_v57 }
 0xa05   :  { %2324 = vmatpush1.bf16.msra.mxu0 %v3024_v9 }
 0xa51   :  { %v1650_v10 = vpop.permute.xlu0 %1649  ;;  %v1645_v12 = vpop.permute.xlu1 %1644 }
 0xa52   :  { %v1652_v48 = vmul.f32 %v1650_v10, %v3811_v28  ;;  %v1647_v40 = vmul.f32 %v1645_v12, %v3734_v60 }
 0xa54   :  { %v1653_v30 = vadd.f32 %v1652_v48, %v1647_v40 }
 0xa56   :  { %v1656_v27 = vpop.permute.xlu1 %1655 }
 0xa57   :  { %v1658_v35 = vmul.f32 %v1656_v27, %v3815_v31  ;;  %v3027_v31 = vld [vmem:[%s4049_s5 + $0x10] ss:$24 sps:$4 sm:$0xff]  }
 0xa59   :  { %v1659_v38 = vadd.f32 %v1658_v35, %v1653_v30 }
 0xa5b   :  { %v1662_v41 = vpop.permute.xlu1 %1661 }
 0xa5c   :  { %v1664_v2 = vmul.f32 %v1662_v41, %v3813_v59 }
 0xa5e   :  { %v1665_v4 = vadd.f32 %v1664_v2, %v1659_v38 }
 0xa60   :  { %v1668_v6 = vpop.permute.xlu1 %1667 }
 0xa61   :  { %v1670_v8 = vmul.f32 %v1668_v6, %v3817_v34  ;;  %v3032_v34 = vld [vmem:[%s4049_s5 + $0x44] ss:$24 sps:$4 sm:$0xff]  }
 0xa63   :  { %v1671_v14 = vadd.f32 %v1670_v8, %v1665_v4 }
 0xa65   :  { %v1674_v16 = vpop.permute.xlu1 %1673 }
 0xa66   :  { %v1676_v18 = vmul.f32 %v1674_v16, %v3819_v11  ;;  %v3030_v11 = vld [vmem:[%s4049_s5 + $0x40] ss:$24 sps:$4 sm:$0xff]  }
 0xa68   :  { %v1677_v20 = vadd.f32 %v1676_v18, %v1671_v14 }
 0xa6a   :  { %v1680_v28 = vpop.permute.xlu1 %1679 }
 0xa6b   :  { %v1682_v60 = vmul.f32 %v1680_v28, %v3821_v13  ;;  %v3035_v13 = vld [vmem:[%s4049_s5 + $0x74] ss:$24 sps:$4 sm:$0xff]  }
 0xa6d   :  { %v3975_v44 = vadd.f32 %v1682_v60, %v1677_v20 }
 0xa6f   :  { %v1979_v59 = vpack.c.bf16 %v3975_v44, %v3975_v44 }
 0xa71   :  { %2301 = vmatmul.mubr.bf16.vlgmr.msra.gmra.mrb[24].mxu1 %v1979_v59  ;;  %2342 = vmatmul.mubr.bf16.vlgmr.msra.gmra.mrb[28].mxu0 %v1979_v59 }
 0xa72   :  { %2351 = vmatpush1.bf16.msra.mxu1 %v3027_v31  ;;  %2382 = vmatprep.mubr.bf16.mxu1 %v3084_v1  ;;  %v3036_v1 = vld [vmem:[%s4049_s5 + $0xa0] ss:$24 sps:$4 sm:$0xff]  }
 0xa73   :  { %2352 = vmatprep.subr.bf16.mxu1 %v3032_v34 }
 0xa76   :  { %2353 = vmatpush1.bf16.msra.mxu1 %v3030_v11 }
 0xa77   :  { %2354 = vmatprep.subr.bf16.mxu1 %v3035_v13 }
 0xa7a   :  { %2355 = vmatpush1.bf16.msra.mxu1 %v3033_v3 }
 0xa7b   :  { %2356 = vmatprep.subr.bf16.mxu1 %v3038_v58 }
 0xa7e   :  { %2357 = vmatpush1.bf16.msra.mxu1 %v3036_v1 }
 0xa7f   :  { %2358 = vmatprep.subr.bf16.mxu1 %v3041_v62 }
 0xa82   :  { %2359 = vmatpush1.bf16.msra.mxu1 %v3039_v33 }
 0xa83   :  { %2360 = vmatprep.subr.bf16.mxu1 %v3044_v5 }
 0xa86   :  { %2361 = vmatpush1.bf16.msra.mxu1 %v3042_v43 }
 0xa87   :  { %2362 = vmatprep.subr.bf16.mxu1 %v3047_v63 }
 0xa8a   :  { %2363 = vmatpush1.bf16.msra.mxu1 %v3045_v36 }
 0xa8b   :  { %2364 = vmatprep.subr.bf16.mxu1 %v3050_v15 }
 0xa8e   :  { %2365 = vmatpush1.bf16.msra.mxu1 %v3048_v17 }
 0xa91   :  { %2383 = vmatmul.mubr.bf16.vlgmr.msra.gmra.mrb[28].mxu1 %v1979_v59 }
 0xabb   :  { %v1945_v21 = vpop.f32.mrb[24].mxu0 }
 0xabc   :  { %v1946_v39 = vadd.f32 %v1945_v21, %v3825_v0  ;;  %v2777_v45 = vpop.f32.mrb[25].mxu0 }
 0xabd   :  { %v1948_v23 = vpop.f32.mrb[26].mxu0 }
 0xabe   :  { %v1951_v22 = vadd.f32 %v3083_v25, %v1946_v39  ;;  %v2778_v46 = vpop.f32.mrb[27].mxu0 }
 0xac0   :  { %1952 = vmax.xlane.f32.xlu1 %v1951_v22 }
 0xb44   :  { %v2302_v47 = vpop.f32.mrb[24].mxu1  ;;  %v2343_v49 = vpop.f32.mrb[28].mxu0 }
 0xb45   :  { %v2304_v53 = vpop.f32.mrb[25].mxu1  ;;  %v2345_v37 = vpop.f32.mrb[29].mxu0 }
 0xb46   :  { %v2306_v42 = vpop.f32.mrb[26].mxu1  ;;  %v2347_v56 = vpop.f32.mrb[30].mxu0 }
 0xb47   :  { %v2307_v61 = vpop.f32.mrb[27].mxu1  ;;  %v2348_v50 = vpop.f32.mrb[31].mxu0 }
 0xb4d   :  { %v1953_v7 = vpop.xlane.xlu1 %1952 }
 0xb4e   :  { %v1972_v51 = vsub.f32 %v1951_v22, %v1953_v7  ;;  %vm1954_vm12 = vcmp.ge.f32.partialorder %v1951_v22, %v1953_v7 }
 0xb4f   :  { %v1955_v27 = vsel %vm1954_vm12, %v3275_v32, 128 }
 0xb50   :  { %v1973_v0 = vmul.f32 1.442695, %v1972_v51  ;;  %v1957_v30 = vshra.s32 %v1955_v27, 16  ;;  %v1956_v34 = vand.u32 65535, %v1955_v27 }
 0xb52   :  { %3077 = vpow2.f32 %v1973_v0 }
 0xb5c   :  { %v3078_v52 = vpop.eup %3077 }
 0xb5d   :  { %1975 = vadd.xlane.f32.xlu0 %v3078_v52 }
 0xb64   :  { %v2384_v54 = vpop.f32.mrb[28].mxu1 }
 0xb65   :  { %v2386_v57 = vpop.f32.mrb[29].mxu1 }
 0xb66   :  { %v2388_v9 = vpop.f32.mrb[30].mxu1 }
 0xb67   :  { %v2389_v10 = vpop.f32.mrb[31].mxu1 }
 0xbea   :  { %v1976_v12 = vpop.xlane.xlu0 %1975 }
 0xbeb   :  { %3079 = vrcp.f32 %v1976_v12 }
 0xbf5   :  { %v3080_v48 = vpop.eup %3079 }
 0xbf6   :  { %v1978_v40 = vmul.f32 %v3080_v48, %v3078_v52 }
 0xbf8   :  { %2398 = vperm.xlu0 %2797, %v1978_v40   ;;  %2393 = vperm.xlu1 %2803, %v1978_v40  }
 0xbfc   :  { %2807 = vset.pattern.permute.xlu0 %v3092_v24  ;;  %2804 = vset.pattern.permute.xlu1 %v3089_v55  ;;  %v1959_v24 = vcvt.s32.f32 %v1957_v30 }
 0xbfd   :  { %2422 = vperm.xlu0 %2807, %v1978_v40   ;;  %2404 = vperm.xlu1 %2804, %v1978_v40  }
 0xc01   :  { %2805 = vset.pattern.permute.xlu1 %v3090_v19  ;;  %2809 = vset.pattern.permute.xlu0 %v3093_v26 }
 0xc02   :  { %2410 = vperm.xlu1 %2805, %v1978_v40  }
 0xc06   :  { %2806 = vset.pattern.permute.xlu1 %v3091_v29 }
 0xc07   :  { %2416 = vperm.xlu1 %2806, %v1978_v40  }
 0xc0b   :  { %2808 = vset.pattern.permute.xlu1 %v3093_v26 }
 0xc0c   :  { %2428 = vperm.xlu1 %2808, %v1978_v40  }
 0xc30   :  { %1960 = vmin.xlane.f32.xlu1 %v1959_v24 }
 0xc77   :  { %v2399_v55 = vpop.permute.xlu0 %2398  ;;  %v2394_v35 = vpop.permute.xlu1 %2393 }
 0xc78   :  { %v2401_v38 = vmul.f32 %v2399_v55, %v2302_v47  ;;  %v2396_v19 = vmul.f32 %v2394_v35, %v3975_v44  ;;  %v1958_v44 = vcvt.s32.f32 %v1956_v34 }
 0xc7a   :  { %v2402_v2 = vadd.f32 %v2401_v38, %v2396_v19 }
 0xc7c   :  { %v2405_v41 = vpop.permute.xlu1 %2404  ;;  %v2423_v26 = vpop.permute.xlu0 %2422 }
 0xc7d   :  { %v2407_v4 = vmul.f32 %v2405_v41, %v2304_v53  ;;  %v2425_v20 = vmul.f32 %v2423_v26, %v2384_v54 }
 0xc7f   :  { %v2408_v6 = vadd.f32 %v2407_v4, %v2402_v2 }
 0xc81   :  { %v2411_v29 = vpop.permute.xlu1 %2410 }
 0xc82   :  { %v2413_v8 = vmul.f32 %v2411_v29, %v2343_v49 }
 0xc84   :  { %v2414_v14 = vadd.f32 %v2413_v8, %v2408_v6 }
 0xc86   :  { %v2417_v16 = vpop.permute.xlu1 %2416 }
 0xc87   :  { %v2419_v18 = vmul.f32 %v2417_v16, %v2345_v37 }
 0xc89   :  { %v2420_v32 = vadd.f32 %v2419_v18, %v2414_v14 }
 0xc8b   :  { %v2429_v28 = vpop.permute.xlu1 %2428  ;;  %v2426_v60 = vadd.f32 %v2425_v20, %v2420_v32 }
 0xc8c   :  { %v2431_v31 = vmul.f32 %v2429_v28, %v2386_v57 }
 0xc8e   :  { %v2432_v59 = vadd.f32 %v2431_v31, %v2426_v60 }
 0xc90   :  { %2433 = vadd.xlane.f32.xlu0 %v2432_v59 }
 0xcbd   :  { %v1961_v11 = vpop.xlane.xlu1 %1960 }
 0xcbe   :  { %vm1962_vm13 = vcmp.eq.f32.partialorder %v1959_v24, %v1961_v11  ;;  %v1967_v33 = vcvt.f32.s32 %v1961_v11 }
 0xcbf   :  { %v1963_v13 = vsel %vm1962_vm13, %v1958_v44, inf }
 0xcc0   :  { %1964 = vmin.xlane.f32.xlu0 %v1963_v13  ;;  %v1968_v43 = vshll.u32 %v1967_v33, 16 }
 0xd1d   :  { %v2434_v3 = vpop.xlane.xlu0 %2433 }
 0xd1e   :  { %v2435_v58 = vmax.f32 %v2434_v3, 1e-20 }
 0xd20   :  { %3081 = vrcp.f32 %v2435_v58 }
 0xd2a   :  { %v3082_v1 = vpop.eup %3081 }
 0xd2b   :  { %v2437_v62 = vmul.f32 %v3082_v1, %v2432_v59 }
 0xd2d   :  { %2438 = vst [vmem:[%s4052_s8] sm:$0xff] %v2437_v62 }
 0xd4d   :  { %v1965_v5 = vpop.xlane.xlu0 %1964 }
 0xd4e   :  { %v1966_v63 = vcvt.f32.s32 %v1965_v5 }
 0xd50   :  { %v1969_v36 = vadd.s32 %v1968_v43, %v1966_v63 }
 0xd52   :  { %2643 = vst.msk [vmem:[%s4051_s7 + $0x10] sm:$0xff] %vm472_vm5, %v1969_v36 }

</bundles_post_ra>
